<compile_context>
chip_gen: v6e
topology: v6e:2x2x1
jax: 0.10.0
libtpu: 0.0.40
codegen_flags: <defaults>
</compile_context>

<pallas_src>
import functools

import jax
import jax.numpy as jnp
from jax.experimental import pallas as pl
from jax.experimental.pallas import tpu as pltpu


def _round_up(x, m):
    return (x + m - 1) // m * m


def _choose_batch_tiling(batch, max_tile=512, sublane=16):
    """Sublane-aligned batch tile; <=1 tile of padding; >=2 tiles when possible."""
    b_rounded = _round_up(batch, sublane)
    n_tiles = pl.cdiv(b_rounded, max_tile)
    if n_tiles == 1 and b_rounded >= 2 * sublane:
        n_tiles = 2                       # v7x: one batch tile per TensorCore
    b_tile = _round_up(pl.cdiv(b_rounded, n_tiles), sublane)
    n_tiles = pl.cdiv(b_rounded, b_tile)
    return b_tile, b_tile * n_tiles


# ----------------------------------------------------------------------------
# Fused kernel: taskwise parameter merge + 2-layer MLP forward
# ----------------------------------------------------------------------------
def _fused_merge_mlp_kernel(alpha_ref,                       # SMEM (K,)
                            x_ref,                           # (B_TILE, D_IN)  bf16
                            pw1_ref, tw1_ref,                # (D_IN,H), (K,D_IN,H)
                            pb1_ref, tb1_ref,                # (1,H),    (K,1,H)
                            pw2_ref, tw2_ref,                # (H,O),    (K,H,O)
                            pb2_ref, tb2_ref,                # (1,O),    (K,1,O)
                            y_ref,                           # (B_TILE, O)  f32
                            *, num_tasks):
    # Hoisted scalar SMEM reads: K loads total for the whole kernel.
    a = [alpha_ref[k] for k in range(num_tasks)]             # K small: static unroll
    rem = 1.0
    for ak in a:
        rem = rem - ak                                        # rem = 1 - sum_k alpha_k

    # merged = rem * pre + sum_k alpha_k * task_k   (== pre + sum_k a_k*(task_k-pre))
    # Merge is done in f32 (matches reference numerics); MXU operands are bf16.
    def merge(pre_ref, tsk_ref):
        m = rem * pre_ref[...]
        for k in range(num_tasks):
            m = m + a[k] * tsk_ref[k]
        return m

    w1 = merge(pw1_ref, tw1_ref).astype(jnp.bfloat16)   # [D_IN, HIDDEN] ([in, out])
    b1 = merge(pb1_ref, tb1_ref)                         # [1, HIDDEN]   (f32 add)
    w2 = merge(pw2_ref, tw2_ref).astype(jnp.bfloat16)    # [HIDDEN, OUT_PAD]
    b2 = merge(pb2_ref, tb2_ref)                         # [1, OUT_PAD]  (f32 add)

    h = jnp.dot(x_ref[...], w1, preferred_element_type=jnp.float32) + b1
    h = jnp.maximum(h, 0.0).astype(jnp.bfloat16)
    y = jnp.dot(h, w2, preferred_element_type=jnp.float32) + b2
    y_ref[...] = y.astype(y_ref.dtype)


# ----------------------------------------------------------------------------
# One-time setup: convert torch-convention params into kernel layout
#   - transpose Linear weights [out,in] -> [in,out]
#   - pad fc2's out dim (and its bias) to a multiple of 128 (lane-dense output)
#   - reshape biases to (1, out)
#   - stack the K task models along a leading axis
# ----------------------------------------------------------------------------
def prepare_merged_model_params(pretrained, task_models):
    out_dim = pretrained["fc2.weight"].shape[0]
    out_pad = _round_up(out_dim, 128)

    def prep(p):
        w1t = p["fc1.weight"].T                                   # [D_IN, HIDDEN]
        w2t = jnp.pad(p["fc2.weight"].T, ((0, 0), (0, out_pad - out_dim)))
        b1 = p["fc1.bias"].reshape(1, -1)
        b2 = jnp.pad(p["fc2.bias"], (0, out_pad - out_dim)).reshape(1, -1)
        return w1t, b1, w2t, b2

    pre = prep(pretrained)
    per_task = [prep(tm) for tm in task_models]
    stacked = tuple(jnp.stack([t[i] for t in per_task], axis=0) for i in range(4))
    return pre, stacked, out_dim


# ----------------------------------------------------------------------------
# Forward: single fused pallas_call, grid over batch tiles
# ----------------------------------------------------------------------------
def merged_model_forward(x_nchw, alphas, pre_params, task_params, out_dim):
    pw1, pb1, pw2, pb2 = pre_params
    tw1, tb1, tw2, tb2 = task_params
    K = alphas.shape[0]

    B = x_nchw.shape[0]
    # row-major flatten == torch x.view(B, -1); stream activations in bf16
    # (x is the only array re-DMA'd every grid step).
    x_flat = x_nchw.reshape(B, -1).astype(jnp.bfloat16)
    d_in, hidden = pw1.shape
    out_pad = pw2.shape[1]

    b_tile, b_padded = _choose_batch_tiling(B)
    if b_padded != B:
        x_flat = jnp.pad(x_flat, ((0, b_padded - B), (0, 0)))

    resident2 = lambda i: (0, 0)                 # weights resident across batch tiles
    resident3 = lambda i: (0, 0, 0)

    y_pad = pl.pallas_call(
        functools.partial(_fused_merge_mlp_kernel, num_tasks=K),
        out_shape=jax.ShapeDtypeStruct((b_padded, out_pad), jnp.float32),
        grid_spec=pltpu.PrefetchScalarGridSpec(
            num_scalar_prefetch=0,
            grid=(b_padded // b_tile,),
            in_specs=[
                pl.BlockSpec(memory_space=pltpu.MemorySpace.SMEM),   # alphas (K,)
                pl.BlockSpec((b_tile, d_in), lambda i: (i, 0)),      # x tile (bf16)
                pl.BlockSpec((d_in, hidden), resident2),             # pre  W1^T
                pl.BlockSpec((K, d_in, hidden), resident3),          # task W1^T
                pl.BlockSpec((1, hidden), resident2),                # pre  b1
                pl.BlockSpec((K, 1, hidden), resident3),             # task b1
                pl.BlockSpec((hidden, out_pad), resident2),          # pre  W2^T
                pl.BlockSpec((K, hidden, out_pad), resident3),       # task W2^T
                pl.BlockSpec((1, out_pad), resident2),               # pre  b2
                pl.BlockSpec((K, 1, out_pad), resident3),            # task b2
            ],
            out_specs=pl.BlockSpec((b_tile, out_pad), lambda i: (i, 0)),
        ),
        compiler_params=pltpu.CompilerParams(
            dimension_semantics=("parallel",)),   # batch tiles split across TCs (v7x)
    )(alphas, x_flat, pw1, tw1, pb1, tb1, pw2, tw2, pb2, tb2)

    return y_pad[:B, :out_dim]


# ----------------------------------------------------------------------------
if __name__ == "__main__":
    B, C, H, W = 2, 4, 16, 16
    D_IN = C * H * W          # 1024
    HIDDEN = 128
    OUT = 16
    K = 2                     # number of task (finetuned) models
    INIT_SCALE = 0.3          # taskwise alpha init, as in the module

    key = jax.random.PRNGKey(0)
    keys = jax.random.split(key, 16)

    # Deterministic synthetic parameters (torch Linear convention [out, in]).
    def make_params(k0, k1, k2, k3, scale=0.02):
        return {
            "fc1.weight": scale * jax.random.normal(k0, (HIDDEN, D_IN), jnp.float32),
            "fc1.bias":   scale * jax.random.normal(k1, (HIDDEN,), jnp.float32),
            "fc2.weight": scale * jax.random.normal(k2, (OUT, HIDDEN), jnp.float32),
            "fc2.bias":   scale * jax.random.normal(k3, (OUT,), jnp.float32),
        }

    pretrained = make_params(*keys[0:4])
    task_models = [make_params(*keys[4 + 4 * t: 8 + 4 * t]) for t in range(K)]

    alphas = jnp.full((K,), INIT_SCALE, dtype=jnp.float32)   # taskwise granularity
    x = jax.random.normal(keys[12], (B, C, H, W), jnp.float32)

    # One-time layout prep (transpose / pad / stack) -- not part of the forward.
    pre_packed, task_packed, out_dim = prepare_merged_model_params(
        pretrained, task_models)

    y = merged_model_forward(x, alphas, pre_packed, task_packed, out_dim)
    y = jax.block_until_ready(y)

    # Pure-JAX f32 reference with the original merge formula and torch layouts.
    def ref_forward():
        merged = {}
        for name, pre in pretrained.items():
            delta = sum(alphas[k] * (task_models[k][name] - pre) for k in range(K))
            merged[name] = pre + delta
        xf = x.reshape(B, -1)
        h = jnp.maximum(xf @ merged["fc1.weight"].T + merged["fc1.bias"], 0.0)
        return h @ merged["fc2.weight"].T + merged["fc2.bias"]

    y_ref = ref_forward()
    assert y.shape == (B, OUT)
    err = jnp.max(jnp.abs(y - y_ref))
    # bf16 MXU operands over a 1024-long contraction vs. an f32 reference:
    # expect ~1e-3-level absolute error, so use a loosened tolerance.
    assert jnp.allclose(y, y_ref, atol=1e-2, rtol=1e-2), f"max abs err {err}"

    print("KERNEL_OK")
</pallas_src>

<mosaic_0001>
module attributes {stable_mosaic.version = 11 : i64} {
  func.func @_fused_merge_mlp_kernel(%arg0: i32, %arg1: memref<2xf32, #tpu.memory_space<smem>>, %arg2: memref<16x1024xbf16, #tpu.memory_space<vmem>>, %arg3: memref<1024x128xf32, #tpu.memory_space<vmem>>, %arg4: memref<2x1024x128xf32, #tpu.memory_space<vmem>>, %arg5: memref<1x128xf32, #tpu.memory_space<vmem>>, %arg6: memref<2x1x128xf32, #tpu.memory_space<vmem>>, %arg7: memref<128x128xf32, #tpu.memory_space<vmem>>, %arg8: memref<2x128x128xf32, #tpu.memory_space<vmem>>, %arg9: memref<1x128xf32, #tpu.memory_space<vmem>>, %arg10: memref<2x1x128xf32, #tpu.memory_space<vmem>>, %arg11: memref<16x128xf32, #tpu.memory_space<vmem>>) attributes {dimension_semantics = [#tpu.dimension_semantics<parallel>], iteration_bounds = array<i64: 1>, scalar_prefetch = 0 : i64, scratch_operands = 0 : i64, tpu.core_type = #tpu.core_type<tc>, window_params = [{transform_indices = @transform_0, window_bounds = array<i64: 2>}, {transform_indices = @transform_1, window_bounds = array<i64: 16, 1024>}, {pipeline_mode = #tpu.pipeline_mode<synchronous>, transform_indices = @transform_2, window_bounds = array<i64: 1024, 128>}, {pipeline_mode = #tpu.pipeline_mode<synchronous>, transform_indices = @transform_3, window_bounds = array<i64: 2, 1024, 128>}, {pipeline_mode = #tpu.pipeline_mode<synchronous>, transform_indices = @transform_4, window_bounds = array<i64: 1, 128>}, {pipeline_mode = #tpu.pipeline_mode<synchronous>, transform_indices = @transform_5, window_bounds = array<i64: 2, 1, 128>}, {pipeline_mode = #tpu.pipeline_mode<synchronous>, transform_indices = @transform_6, window_bounds = array<i64: 128, 128>}, {pipeline_mode = #tpu.pipeline_mode<synchronous>, transform_indices = @transform_7, window_bounds = array<i64: 2, 128, 128>}, {pipeline_mode = #tpu.pipeline_mode<synchronous>, transform_indices = @transform_8, window_bounds = array<i64: 1, 128>}, {pipeline_mode = #tpu.pipeline_mode<synchronous>, transform_indices = @transform_9, window_bounds = array<i64: 2, 1, 128>}, {transform_indices = @transform_10, window_bounds = array<i64: 16, 128>}]} {
    %c0 = arith.constant 0 : index
    %0 = memref.load %arg1[%c0] : memref<2xf32, #tpu.memory_space<smem>>
    %c1 = arith.constant 1 : index
    %1 = memref.load %arg1[%c1] : memref<2xf32, #tpu.memory_space<smem>>
    %cst = arith.constant 1.000000e+00 : f32
    %2 = arith.subf %cst, %0 : f32
    %3 = arith.subf %2, %1 : f32
    %c0_0 = arith.constant 0 : index
    %c0_1 = arith.constant 0 : index
    %4 = vector.load %arg3[%c0_0, %c0_1] : memref<1024x128xf32, #tpu.memory_space<vmem>>, vector<1024x128xf32>
    %5 = vector.broadcast %3 : f32 to vector<1024x128xf32>
    %6 = arith.mulf %5, %4 : vector<1024x128xf32>
    %c0_2 = arith.constant 0 : index
    %c0_3 = arith.constant 0 : index
    %c0_4 = arith.constant 0 : index
    %7 = vector.load %arg4[%c0_2, %c0_3, %c0_4] : memref<2x1024x128xf32, #tpu.memory_space<vmem>>, vector<1x1024x128xf32>
    %8 = vector.shape_cast %7 : vector<1x1024x128xf32> to vector<1024x128xf32>
    %9 = vector.broadcast %0 : f32 to vector<1024x128xf32>
    %10 = arith.mulf %9, %8 : vector<1024x128xf32>
    %11 = arith.addf %6, %10 : vector<1024x128xf32>
    %c1_5 = arith.constant 1 : index
    %c0_6 = arith.constant 0 : index
    %c0_7 = arith.constant 0 : index
    %12 = vector.load %arg4[%c1_5, %c0_6, %c0_7] : memref<2x1024x128xf32, #tpu.memory_space<vmem>>, vector<1x1024x128xf32>
    %13 = vector.shape_cast %12 : vector<1x1024x128xf32> to vector<1024x128xf32>
    %14 = vector.broadcast %1 : f32 to vector<1024x128xf32>
    %15 = arith.mulf %14, %13 : vector<1024x128xf32>
    %16 = arith.addf %11, %15 : vector<1024x128xf32>
    %17 = arith.truncf %16 : vector<1024x128xf32> to vector<1024x128xbf16>
    %c0_8 = arith.constant 0 : index
    %c0_9 = arith.constant 0 : index
    %18 = vector.load %arg5[%c0_8, %c0_9] : memref<1x128xf32, #tpu.memory_space<vmem>>, vector<1x128xf32>
    %19 = vector.broadcast %3 : f32 to vector<1x128xf32>
    %20 = arith.mulf %19, %18 : vector<1x128xf32>
    %c0_10 = arith.constant 0 : index
    %c0_11 = arith.constant 0 : index
    %c0_12 = arith.constant 0 : index
    %21 = vector.load %arg6[%c0_10, %c0_11, %c0_12] : memref<2x1x128xf32, #tpu.memory_space<vmem>>, vector<1x1x128xf32>
    %22 = vector.shape_cast %21 : vector<1x1x128xf32> to vector<1x128xf32>
    %23 = vector.broadcast %0 : f32 to vector<1x128xf32>
    %24 = arith.mulf %23, %22 : vector<1x128xf32>
    %25 = arith.addf %20, %24 : vector<1x128xf32>
    %c1_13 = arith.constant 1 : index
    %c0_14 = arith.constant 0 : index
    %c0_15 = arith.constant 0 : index
    %26 = vector.load %arg6[%c1_13, %c0_14, %c0_15] : memref<2x1x128xf32, #tpu.memory_space<vmem>>, vector<1x1x128xf32>
    %27 = vector.shape_cast %26 : vector<1x1x128xf32> to vector<1x128xf32>
    %28 = vector.broadcast %1 : f32 to vector<1x128xf32>
    %29 = arith.mulf %28, %27 : vector<1x128xf32>
    %30 = arith.addf %25, %29 : vector<1x128xf32>
    %c0_16 = arith.constant 0 : index
    %c0_17 = arith.constant 0 : index
    %31 = vector.load %arg7[%c0_16, %c0_17] : memref<128x128xf32, #tpu.memory_space<vmem>>, vector<128x128xf32>
    %32 = vector.broadcast %3 : f32 to vector<128x128xf32>
    %33 = arith.mulf %32, %31 : vector<128x128xf32>
    %c0_18 = arith.constant 0 : index
    %c0_19 = arith.constant 0 : index
    %c0_20 = arith.constant 0 : index
    %34 = vector.load %arg8[%c0_18, %c0_19, %c0_20] : memref<2x128x128xf32, #tpu.memory_space<vmem>>, vector<1x128x128xf32>
    %35 = vector.shape_cast %34 : vector<1x128x128xf32> to vector<128x128xf32>
    %36 = vector.broadcast %0 : f32 to vector<128x128xf32>
    %37 = arith.mulf %36, %35 : vector<128x128xf32>
    %38 = arith.addf %33, %37 : vector<128x128xf32>
    %c1_21 = arith.constant 1 : index
    %c0_22 = arith.constant 0 : index
    %c0_23 = arith.constant 0 : index
    %39 = vector.load %arg8[%c1_21, %c0_22, %c0_23] : memref<2x128x128xf32, #tpu.memory_space<vmem>>, vector<1x128x128xf32>
    %40 = vector.shape_cast %39 : vector<1x128x128xf32> to vector<128x128xf32>
    %41 = vector.broadcast %1 : f32 to vector<128x128xf32>
    %42 = arith.mulf %41, %40 : vector<128x128xf32>
    %43 = arith.addf %38, %42 : vector<128x128xf32>
    %44 = arith.truncf %43 : vector<128x128xf32> to vector<128x128xbf16>
    %c0_24 = arith.constant 0 : index
    %c0_25 = arith.constant 0 : index
    %45 = vector.load %arg9[%c0_24, %c0_25] : memref<1x128xf32, #tpu.memory_space<vmem>>, vector<1x128xf32>
    %46 = vector.broadcast %3 : f32 to vector<1x128xf32>
    %47 = arith.mulf %46, %45 : vector<1x128xf32>
    %c0_26 = arith.constant 0 : index
    %c0_27 = arith.constant 0 : index
    %c0_28 = arith.constant 0 : index
    %48 = vector.load %arg10[%c0_26, %c0_27, %c0_28] : memref<2x1x128xf32, #tpu.memory_space<vmem>>, vector<1x1x128xf32>
    %49 = vector.shape_cast %48 : vector<1x1x128xf32> to vector<1x128xf32>
    %50 = vector.broadcast %0 : f32 to vector<1x128xf32>
    %51 = arith.mulf %50, %49 : vector<1x128xf32>
    %52 = arith.addf %47, %51 : vector<1x128xf32>
    %c1_29 = arith.constant 1 : index
    %c0_30 = arith.constant 0 : index
    %c0_31 = arith.constant 0 : index
    %53 = vector.load %arg10[%c1_29, %c0_30, %c0_31] : memref<2x1x128xf32, #tpu.memory_space<vmem>>, vector<1x1x128xf32>
    %54 = vector.shape_cast %53 : vector<1x1x128xf32> to vector<1x128xf32>
    %55 = vector.broadcast %1 : f32 to vector<1x128xf32>
    %56 = arith.mulf %55, %54 : vector<1x128xf32>
    %57 = arith.addf %52, %56 : vector<1x128xf32>
    %c0_32 = arith.constant 0 : index
    %c0_33 = arith.constant 0 : index
    %58 = vector.load %arg2[%c0_32, %c0_33] : memref<16x1024xbf16, #tpu.memory_space<vmem>>, vector<16x1024xbf16>
    %cst_34 = arith.constant dense<0.000000e+00> : vector<16x128xf32>
    %59 = tpu.matmul %58, %17, %cst_34 {dimension_numbers = #tpu.dot_dimension_numbers<[1], [0], [0], [1], [0, 0, 1, 1], [], []>} : vector<16x1024xbf16>, vector<1024x128xbf16>, vector<16x128xf32> -> vector<16x128xf32>
    %60 = vector.broadcast %30 : vector<1x128xf32> to vector<16x128xf32>
    %61 = arith.addf %59, %60 : vector<16x128xf32>
    %cst_35 = arith.constant 0.000000e+00 : f32
    %62 = vector.broadcast %cst_35 : f32 to vector<16x128xf32>
    %63 = arith.maximumf %61, %62 : vector<16x128xf32>
    %64 = arith.truncf %63 : vector<16x128xf32> to vector<16x128xbf16>
    %cst_36 = arith.constant dense<0.000000e+00> : vector<16x128xf32>
    %65 = tpu.matmul %64, %44, %cst_36 {dimension_numbers = #tpu.dot_dimension_numbers<[1], [0], [0], [1], [0, 0, 1, 1], [], []>} : vector<16x128xbf16>, vector<128x128xbf16>, vector<16x128xf32> -> vector<16x128xf32>
    %66 = vector.broadcast %57 : vector<1x128xf32> to vector<16x128xf32>
    %67 = arith.addf %65, %66 : vector<16x128xf32>
    %c0_37 = arith.constant 0 : index
    %c0_38 = arith.constant 0 : index
    %68 = vector.load %arg11[%c0_37, %c0_38] : memref<16x128xf32, #tpu.memory_space<vmem>>, vector<16x128xf32>
    tpu.vector_store %arg11[%c0_37, %c0_38], %67 {strides = array<i32>} : memref<16x128xf32, #tpu.memory_space<vmem>>, vector<16x128xf32>,
    return
  }
  func.func @transform_0(%arg0: i32) -> i32 {
    %c0_i32 = arith.constant 0 : i32
    %c0_i32_0 = arith.constant 0 : i32
    return %c0_i32 : i32
  }
  func.func @transform_1(%arg0: i32) -> (i32, i32) {
    %c0_i32 = arith.constant 0 : i32
    %c0_i32_0 = arith.constant 0 : i32
    return %arg0, %c0_i32 : i32, i32
  }
  func.func @transform_2(%arg0: i32) -> (i32, i32) {
    %c0_i32 = arith.constant 0 : i32
    %c0_i32_0 = arith.constant 0 : i32
    %c0_i32_1 = arith.constant 0 : i32
    return %c0_i32, %c0_i32_0 : i32, i32
  }
  func.func @transform_3(%arg0: i32) -> (i32, i32, i32) {
    %c0_i32 = arith.constant 0 : i32
    %c0_i32_0 = arith.constant 0 : i32
    %c0_i32_1 = arith.constant 0 : i32
    %c0_i32_2 = arith.constant 0 : i32
    return %c0_i32, %c0_i32_0, %c0_i32_1 : i32, i32, i32
  }
  func.func @transform_4(%arg0: i32) -> (i32, i32) {
    %c0_i32 = arith.constant 0 : i32
    %c0_i32_0 = arith.constant 0 : i32
    %c0_i32_1 = arith.constant 0 : i32
    return %c0_i32, %c0_i32_0 : i32, i32
  }
  func.func @transform_5(%arg0: i32) -> (i32, i32, i32) {
    %c0_i32 = arith.constant 0 : i32
    %c0_i32_0 = arith.constant 0 : i32
    %c0_i32_1 = arith.constant 0 : i32
    %c0_i32_2 = arith.constant 0 : i32
    return %c0_i32, %c0_i32_0, %c0_i32_1 : i32, i32, i32
  }
  func.func @transform_6(%arg0: i32) -> (i32, i32) {
    %c0_i32 = arith.constant 0 : i32
    %c0_i32_0 = arith.constant 0 : i32
    %c0_i32_1 = arith.constant 0 : i32
    return %c0_i32, %c0_i32_0 : i32, i32
  }
  func.func @transform_7(%arg0: i32) -> (i32, i32, i32) {
    %c0_i32 = arith.constant 0 : i32
    %c0_i32_0 = arith.constant 0 : i32
    %c0_i32_1 = arith.constant 0 : i32
    %c0_i32_2 = arith.constant 0 : i32
    return %c0_i32, %c0_i32_0, %c0_i32_1 : i32, i32, i32
  }
  func.func @transform_8(%arg0: i32) -> (i32, i32) {
    %c0_i32 = arith.constant 0 : i32
    %c0_i32_0 = arith.constant 0 : i32
    %c0_i32_1 = arith.constant 0 : i32
    return %c0_i32, %c0_i32_0 : i32, i32
  }
  func.func @transform_9(%arg0: i32) -> (i32, i32, i32) {
    %c0_i32 = arith.constant 0 : i32
    %c0_i32_0 = arith.constant 0 : i32
    %c0_i32_1 = arith.constant 0 : i32
    %c0_i32_2 = arith.constant 0 : i32
    return %c0_i32, %c0_i32_0, %c0_i32_1 : i32, i32, i32
  }
  func.func @transform_10(%arg0: i32) -> (i32, i32) {
    %c0_i32 = arith.constant 0 : i32
    %c0_i32_0 = arith.constant 0 : i32
    return %arg0, %c0_i32 : i32, i32
  }
}

</mosaic_0001>

<bundles_post_ra>
// kernel: tpu_custom_call.1
= control target key start
LH: loop header
LB: loop body
LE: loop exit
PB: predicated region body
PF: predicated region fallthrough
CT: control target
= control target key end

     0   :  { %15 = vsyncpa [#allocation5], 0  ;;  %s2535_s0 = inlined_call_operand.hbm [shape: f32[2], index: 0, kind: input, shape index: {}]   ;;  %s2536_s1 = inlined_call_operand.hbm [shape: bf16[16,1024], index: 1, kind: input, shape index: {}]   ;;  %s2537_s2 = inlined_call_operand.hbm [shape: f32[1024,128], index: 2, kind: input, shape index: {}]   ;;  %s2538_s3 = inlined_call_operand.hbm [shape: f32[2,1024,128], index: 3, kind: input, shape index: {}]   ;;  %s2539_s4 = inlined_call_operand.vmem [shape: f32[1,128], index: 4, kind: input, shape index: {}]   ;;  %s2540_s5 = inlined_call_operand.vmem [shape: f32[2,1,128], index: 5, kind: input, shape index: {}]   ;;  %s2541_s6 = inlined_call_operand.hbm [shape: f32[128,128], index: 6, kind: input, shape index: {}]   ;;  %s2542_s7 = inlined_call_operand.hbm [shape: f32[2,128,128], index: 7, kind: input, shape index: {}]   ;;  %s2543_s8 = inlined_call_operand.vmem [shape: f32[1,128], index: 8, kind: input, shape index: {}]   ;;  %s2544_s9 = inlined_call_operand.vmem [shape: f32[2,1,128], index: 9, kind: input, shape index: {}]   ;;  %s2545_s10 = inlined_call_operand.hbm [shape: f32[16,128], index: 10, kind: output, shape index: {}]  }
   0x1   :  { %16 = vsyncpa [#allocation3], 0 }
   0x2   :  { %17 = vsyncpa [#allocation8], 0 }
   0x3   :  { %18 = vsyncpa [#allocation11], 0 }
   0x4   :  { %19 = vsyncpa [#allocation4], 0  ;;  %s1936_s13 = smov [#allocation7]  }
   0x5   :  { %s45_s14 = sshll.u32 %s1936_s13, 4  ;;  %s46_s14 = int_to_ptr.vmem [resolvable:$true] %s45_s14 }
   0x6   :  { %s1806_s15 = scalar_lea.vmem %s46_s14, 16384  ;;  %p1811_p1 = scmp.lt.s32.totalorder %s46_s14, %s46_s14 }
   0x7   :  { %p1807_p0 = scmp.ne.s32.totalorder %s46_s14, %s1806_s15  ;;  %p1812_p2 = scmp.lt.s32.totalorder %s1806_s15, %s1806_s15 }
   0x9   :  { %p1813_p3 = por %p1812_p2, %p1811_p1 }
   0xb   :  { %p1814_p4 = pnand %p1813_p3, %p1807_p0 }
   0xd   :  { %1817 = shalt.err (!%p1814_p4)
}
   0xe   :  { %s1937_s16 = smov 128   ;;  %s1938_s17 = smov 8  }
   0xf   :  { %51 = dma.hbm_to_vmem [thread:$0]  %s2537_s2, 16384, %s46_s14, [#allocation8], %s1937_s16, %s1937_s16, %s1938_s17  }
  0x10   :  { %s1939_s20 = smov [#allocation10]  }
  0x11   :  { %s73_s21 = sshll.u32 %s1939_s20, 4  ;;  %s74_s21 = int_to_ptr.vmem [resolvable:$true] %s73_s21 }
  0x12   :  { %s1826_s22 = scalar_lea.vmem %s74_s21, 2048  ;;  %p1831_p6 = scmp.lt.s32.totalorder %s74_s21, %s74_s21 }
  0x13   :  { %p1827_p5 = scmp.ne.s32.totalorder %s74_s21, %s1826_s22  ;;  %p1832_p7 = scmp.lt.s32.totalorder %s1826_s22, %s1826_s22 }
  0x15   :  { %p1833_p8 = por %p1832_p7, %p1831_p6 }
  0x17   :  { %p1834_p9 = pnand %p1833_p8, %p1827_p5 }
  0x19   :  { %1837 = shalt.err (!%p1834_p9)
}
  0x1a   :  { %79 = dma.hbm_to_vmem [thread:$0]  %s2541_s6, 2048, %s74_s21, [#allocation11], %s1937_s16, %s1937_s16, %s1938_s17  }
  0x1b   :  { %s1940_s25 = smov [#allocation2]   ;;  %s1941_s27 = smov [#allocation6]  }
  0x1c   :  { %27 = dma.hbm_to_smem %s2535_s0, 16, %s1940_s25, [#allocation5]  }
  0x1d   :  { %s33_s28 = sshll.u32 %s1941_s27, 4  ;;  %s34_s28 = int_to_ptr.vmem [resolvable:$true] %s33_s28 }
  0x1e   :  { %s1854_s29 = scalar_lea.vmem %s34_s28, 1024  ;;  %p1859_p11 = scmp.lt.s32.totalorder %s34_s28, %s34_s28 }
  0x1f   :  { %p1855_p10 = scmp.ne.s32.totalorder %s34_s28, %s1854_s29  ;;  %p1860_p12 = scmp.lt.s32.totalorder %s1854_s29, %s1854_s29 }
  0x21   :  { %p1861_p13 = por %p1860_p12, %p1859_p11 }
  0x23   :  { %p1862_p0 = pnand %p1861_p13, %p1855_p10 }
  0x25   :  { %1865 = shalt.err (!%p1862_p0)
}
  0x26   :  { %s1942_s30 = smov 512   ;;  %s1943_s11 = smov 32  }
  0x27   :  { %39 = dma.hbm_to_vmem [thread:$0]  %s2536_s1, 1024, %s34_s28, [#allocation3], %s1942_s30, %s1942_s30, %s1943_s11  }
  0x28   :  { %s1944_s6 = smov [#allocation9]   ;;  %s1945_s15 = smov [#allocation12]  }
  0x29   :  { %s57_s14 = sshll.u32 %s1944_s6, 4  ;;  %s85_s0 = sshll.u32 %s1945_s15, 4  ;;  %s58_s14 = int_to_ptr.vmem [resolvable:$true] %s57_s14  ;;  %s86_s0 = int_to_ptr.vmem [resolvable:$true] %s85_s0 }
  0x2a   :  { %s1874_s18 = scalar_lea.vmem %s58_s14, 32768  ;;  %p1879_p2 = scmp.lt.s32.totalorder %s58_s14, %s58_s14 }
  0x2b   :  { %p1875_p1 = scmp.ne.s32.totalorder %s58_s14, %s1874_s18  ;;  %p1880_p3 = scmp.lt.s32.totalorder %s1874_s18, %s1874_s18 }
  0x2d   :  { %p1881_p4 = por %p1880_p3, %p1879_p2 }
  0x2f   :  { %p1882_p5 = pnand %p1881_p4, %p1875_p1 }
  0x31   :  { %1885 = shalt.err (!%p1882_p5)
}
  0x32   :  { %63 = dma.hbm_to_vmem [thread:$0]  %s2538_s3, 32768, %s58_s14, [#allocation8], %s1937_s16, %s1937_s16, %s1938_s17  }
  0x33   :  { %s1894_s1 = scalar_lea.vmem %s86_s0, 4096  ;;  %p1899_p7 = scmp.lt.s32.totalorder %s86_s0, %s86_s0 }
  0x34   :  { %p1895_p6 = scmp.ne.s32.totalorder %s86_s0, %s1894_s1  ;;  %p1900_p8 = scmp.lt.s32.totalorder %s1894_s1, %s1894_s1 }
  0x36   :  { %p1901_p9 = por %p1900_p8, %p1899_p7 }
  0x38   :  { %p1902_p10 = pnand %p1901_p9, %p1895_p6 }
  0x3a   :  { %1905 = shalt.err (!%p1902_p10)
}
  0x3b   :  { %91 = dma.hbm_to_vmem [thread:$0]  %s2542_s7, 4096, %s86_s0, [#allocation11], %s1937_s16, %s1937_s16, %s1938_s17  }
  0x3c   :  { %1926 = dma.done.wait [#allocation5], 16  }
  0x3d   :  { %1927 = vsyncadd [#allocation5], 4294967280 }
  0x3e   :  { %1928 = dma.done.wait [#allocation3], 1024  }
  0x3f   :  { %1929 = vsyncadd [#allocation3], 4294966272 }
  0x40   :  { %1930 = dma.done.wait [#allocation8], 49152  }
  0x41   :  { %1931 = vsyncadd [#allocation8], 4294918144 }
  0x42   :  { %1932 = dma.done.wait [#allocation11], 6144  }
  0x43   :  { %1933 = vsyncadd [#allocation11], 4294961152 }
  0x44   :  { %114 = sfence }
  0x45   :  { %s116_s3 = sld [smem:[#allocation2]]  ;;  %v407_v0 = vld [vmem:[#allocation9 + $0xf0] sm:$0xff]  ;;  %v408_v1 = vld [vmem:[#allocation9 + $0xf8] sm:$0xff]  ;;  %v148_v57 = vld [vmem:[#allocation7 + $0xe0] sm:$0xff]  ;;  %vm1947_vm0 = vmmov 0  }
  0x46   :  { %s1657_s23 = sld [smem:[#allocation2 + $0x1]]  ;;  %v793_v2 = vld [vmem:[#allocation9 + $0x4f0] sm:$0xff]  ;;  %v794_v3 = vld [vmem:[#allocation9 + $0x4f8] sm:$0xff]  ;;  %v149_v58 = vld [vmem:[#allocation7 + $0xe8] sm:$0xff] }
  0x47   :  { %v439_v4 = vld [vmem:[#allocation9 + $0x1f0] sm:$0xff]  ;;  %v440_v5 = vld [vmem:[#allocation9 + $0x1f8] sm:$0xff]  ;;  %v405_v63 = vld [vmem:[#allocation9 + $0xe0] sm:$0xff] }
  0x48   :  { %v825_v6 = vld [vmem:[#allocation9 + $0x5f0] sm:$0xff]  ;;  %v826_v7 = vld [vmem:[#allocation9 + $0x5f8] sm:$0xff] }
  0x49   :  { %v150_v8 = vld [vmem:[#allocation7 + $0xf0] sm:$0xff]  ;;  %v151_v9 = vld [vmem:[#allocation7 + $0xf8] sm:$0xff] }
  0x4a   :  { %v391_v11 = vld [vmem:[#allocation9 + $0x70] sm:$0xff]  ;;  %v392_v12 = vld [vmem:[#allocation9 + $0x78] sm:$0xff] }
  0x4b   :  { %s118_s7 = ssub.f32 1.0, %s116_s3  ;;  %v2034_v10 = vstv %s116_s3  ;;  %v777_v13 = vld [vmem:[#allocation9 + $0x470] sm:$0xff]  ;;  %v778_v18 = vld [vmem:[#allocation9 + $0x478] sm:$0xff] }
  0x4c   :  { %v536_v14 = vmul.f32 %v2034_v10, %v407_v0  ;;  %v537_v15 = vmul.f32 %v2034_v10, %v408_v1  ;;  %v2038_v16 = vstv %s1657_s23  ;;  %v568_v17 = vmul.f32 %v2034_v10, %v439_v4  ;;  %v423_v19 = vld [vmem:[#allocation9 + $0x170] sm:$0xff]  ;;  %v424_v20 = vld [vmem:[#allocation9 + $0x178] sm:$0xff]  ;;  %v406_v4 = vld [vmem:[#allocation9 + $0xe8] sm:$0xff] }
  0x4d   :  { %s119_s24 = ssub.f32 %s118_s7, %s1657_s23  ;;  %v922_v21 = vmul.f32 %v2038_v16, %v793_v2  ;;  %v923_v22 = vmul.f32 %v2038_v16, %v794_v3  ;;  %v182_v23 = vld [vmem:[#allocation7 + $0x1f0] sm:$0xff]  ;;  %v183_v24 = vld [vmem:[#allocation7 + $0x1f8] sm:$0xff]  ;;  %v569_v25 = vmul.f32 %v2034_v10, %v440_v5  ;;  %v954_v26 = vmul.f32 %v2038_v16, %v825_v6  ;;  %v791_v5 = vld [vmem:[#allocation9 + $0x4e0] sm:$0xff] }
  0x4e   :  { %v134_v27 = vld [vmem:[#allocation7 + $0x70] sm:$0xff]  ;;  %v955_v28 = vmul.f32 %v2038_v16, %v826_v7  ;;  %v135_v29 = vld [vmem:[#allocation7 + $0x78] sm:$0xff]  ;;  %v520_v30 = vmul.f32 %v2034_v10, %v391_v11  ;;  %v521_v31 = vmul.f32 %v2034_v10, %v392_v12  ;;  %v906_v32 = vmul.f32 %v2038_v16, %v777_v13  ;;  %v792_v6 = vld [vmem:[#allocation9 + $0x4e8] sm:$0xff] }
  0x4f   :  { %v166_v33 = vld [vmem:[#allocation7 + $0x170] sm:$0xff]  ;;  %v167_v34 = vld [vmem:[#allocation7 + $0x178] sm:$0xff]  ;;  %v2049_v35 = vstv %s119_s24  ;;  %v907_v36 = vmul.f32 %v2038_v16, %v778_v18  ;;  %v552_v37 = vmul.f32 %v2034_v10, %v423_v19  ;;  %v553_v38 = vmul.f32 %v2034_v10, %v424_v20  ;;  %v180_v12 = vld [vmem:[#allocation7 + $0x1e0] sm:$0xff] }
  0x50   :  { %v279_v39 = vmul.f32 %v2049_v35, %v150_v8  ;;  %v280_v40 = vmul.f32 %v2049_v35, %v151_v9  ;;  %v311_v41 = vmul.f32 %v2049_v35, %v182_v23  ;;  %v312_v42 = vmul.f32 %v2049_v35, %v183_v24  ;;  %v809_v51 = vld [vmem:[#allocation9 + $0x570] sm:$0xff]  ;;  %v810_v52 = vld [vmem:[#allocation9 + $0x578] sm:$0xff]  ;;  %v181_v13 = vld [vmem:[#allocation7 + $0x1e8] sm:$0xff] }
  0x51   :  { %v263_v43 = vmul.f32 %v2049_v35, %v134_v27  ;;  %v264_v44 = vmul.f32 %v2049_v35, %v135_v29  ;;  %v295_v45 = vmul.f32 %v2049_v35, %v166_v33  ;;  %v296_v46 = vmul.f32 %v2049_v35, %v167_v34  ;;  %v437_v19 = vld [vmem:[#allocation9 + $0x1e0] sm:$0xff]  ;;  %v438_v20 = vld [vmem:[#allocation9 + $0x1e8] sm:$0xff] }
  0x52   :  { %v664_v47 = vadd.f32 %v536_v14, %v279_v39  ;;  %v665_v48 = vadd.f32 %v537_v15, %v280_v40  ;;  %v696_v49 = vadd.f32 %v568_v17, %v311_v41  ;;  %v697_v50 = vadd.f32 %v569_v25, %v312_v42  ;;  %v824_v25 = vld [vmem:[#allocation9 + $0x5e8] sm:$0xff]  ;;  %v775_v39 = vld [vmem:[#allocation9 + $0x460] sm:$0xff] }
  0x53   :  { %v648_v53 = vadd.f32 %v520_v30, %v263_v43  ;;  %v649_v54 = vadd.f32 %v521_v31, %v264_v44  ;;  %v680_v55 = vadd.f32 %v552_v37, %v295_v45  ;;  %v681_v56 = vadd.f32 %v553_v38, %v296_v46  ;;  %v133_v27 = vld [vmem:[#allocation7 + $0x68] sm:$0xff]  ;;  %v164_v41 = vld [vmem:[#allocation7 + $0x160] sm:$0xff] }
  0x54   :  { %v1050_v59 = vadd.f32 %v922_v21, %v664_v47  ;;  %v1051_v60 = vadd.f32 %v923_v22, %v665_v48  ;;  %v1082_v61 = vadd.f32 %v954_v26, %v696_v49  ;;  %v1083_v62 = vadd.f32 %v955_v28, %v697_v50  ;;  %v823_v21 = vld [vmem:[#allocation9 + $0x5e0] sm:$0xff]  ;;  %v390_v33 = vld [vmem:[#allocation9 + $0x68] sm:$0xff] }
  0x55   :  { %v1034_v0 = vadd.f32 %v906_v32, %v648_v53  ;;  %v1035_v1 = vadd.f32 %v907_v36, %v649_v54  ;;  %v938_v2 = vmul.f32 %v2038_v16, %v809_v51  ;;  %v939_v3 = vmul.f32 %v2038_v16, %v810_v52  ;;  %v132_v26 = vld [vmem:[#allocation7 + $0x60] sm:$0xff]  ;;  %v776_v40 = vld [vmem:[#allocation9 + $0x468] sm:$0xff] }
  0x56   :  { %v1163_v7 = vpack.c.bf16 %v1051_v60, %v1050_v59  ;;  %v1179_v8 = vpack.c.bf16 %v1083_v62, %v1082_v61  ;;  %v277_v9 = vmul.f32 %v2049_v35, %v148_v57  ;;  %v278_v11 = vmul.f32 %v2049_v35, %v149_v58  ;;  %v389_v32 = vld [vmem:[#allocation9 + $0x60] sm:$0xff]  ;;  %v165_v50 = vld [vmem:[#allocation7 + $0x168] sm:$0xff] }
  0x57   :  { %v1155_v14 = vpack.c.bf16 %v1035_v1, %v1034_v0  ;;  %v1066_v15 = vadd.f32 %v938_v2, %v680_v55  ;;  %v1067_v17 = vadd.f32 %v939_v3, %v681_v56  ;;  %v534_v18 = vmul.f32 %v2034_v10, %v405_v63  ;;  %v421_v51 = vld [vmem:[#allocation9 + $0x160] sm:$0xff]  ;;  %v422_v52 = vld [vmem:[#allocation9 + $0x168] sm:$0xff]  ;;  %v146_v63 = vld [vmem:[#allocation7 + $0xd0] sm:$0xff] }
  0x58   :  { %1668 = vmatprep.subr.bf16.mxu0 %v1163_v7  ;;  %1690 = vmatprep.subr.bf16.mxu1 %v1179_v8  ;;  %v535_v22 = vmul.f32 %v2034_v10, %v406_v4  ;;  %v920_v23 = vmul.f32 %v2038_v16, %v791_v5  ;;  %v921_v24 = vmul.f32 %v2038_v16, %v792_v6  ;;  %v807_v57 = vld [vmem:[#allocation9 + $0x560] sm:$0xff]  ;;  %v808_v58 = vld [vmem:[#allocation9 + $0x568] sm:$0xff]  ;;  %v147_v0 = vld [vmem:[#allocation7 + $0xd8] sm:$0xff] }
  0x59   :  { %1669 = vmatpush3.bf16.msra.mxu0 %v1155_v14  ;;  %v1171_v28 = vpack.c.bf16 %v1067_v17, %v1066_v15  ;;  %v662_v29 = vadd.f32 %v534_v18, %v277_v9  ;;  %v309_v30 = vmul.f32 %v2049_v35, %v180_v12  ;;  %v310_v31 = vmul.f32 %v2049_v35, %v181_v13  ;;  %v403_v5 = vld [vmem:[#allocation9 + $0xd0] sm:$0xff]  ;;  %v404_v6 = vld [vmem:[#allocation9 + $0xd8] sm:$0xff] }
  0x5a   :  { %v663_v34 = vadd.f32 %v535_v22, %v278_v11  ;;  %v566_v36 = vmul.f32 %v2034_v10, %v437_v19  ;;  %v567_v37 = vmul.f32 %v2034_v10, %v438_v20  ;;  %v952_v38 = vmul.f32 %v2038_v16, %v823_v21  ;;  %v789_v7 = vld [vmem:[#allocation9 + $0x4d0] sm:$0xff]  ;;  %v790_v13 = vld [vmem:[#allocation9 + $0x4d8] sm:$0xff] }
  0x5b   :  { %1691 = vmatpush3.bf16.msra.mxu1 %v1171_v28  ;;  %v1048_v42 = vadd.f32 %v920_v23, %v662_v29  ;;  %v953_v43 = vmul.f32 %v2038_v16, %v824_v25  ;;  %v261_v44 = vmul.f32 %v2049_v35, %v132_v26  ;;  %v262_v45 = vmul.f32 %v2049_v35, %v133_v27  ;;  %v178_v19 = vld [vmem:[#allocation7 + $0x1d0] sm:$0xff]  ;;  %v179_v20 = vld [vmem:[#allocation7 + $0x1d8] sm:$0xff] }
  0x5c   :  { %v1049_v46 = vadd.f32 %v921_v24, %v663_v34  ;;  %v694_v47 = vadd.f32 %v566_v36, %v309_v30  ;;  %v695_v48 = vadd.f32 %v567_v37, %v310_v31  ;;  %v518_v49 = vmul.f32 %v2034_v10, %v389_v32  ;;  %v435_v25 = vld [vmem:[#allocation9 + $0x1d0] sm:$0xff]  ;;  %v436_v26 = vld [vmem:[#allocation9 + $0x1d8] sm:$0xff] }
  0x5d   :  { %v519_v53 = vmul.f32 %v2034_v10, %v390_v33  ;;  %v904_v54 = vmul.f32 %v2038_v16, %v775_v39  ;;  %v905_v55 = vmul.f32 %v2038_v16, %v776_v40  ;;  %v293_v56 = vmul.f32 %v2049_v35, %v164_v41  ;;  %v821_v27 = vld [vmem:[#allocation9 + $0x5d0] sm:$0xff]  ;;  %v822_v32 = vld [vmem:[#allocation9 + $0x5d8] sm:$0xff] }
  0x5e   :  { %v1162_v59 = vpack.c.bf16 %v1049_v46, %v1048_v42  ;;  %v1080_v60 = vadd.f32 %v952_v38, %v694_v47  ;;  %v1081_v61 = vadd.f32 %v953_v43, %v695_v48  ;;  %v646_v62 = vadd.f32 %v518_v49, %v261_v44  ;;  %v130_v33 = vld [vmem:[#allocation7 + $0x50] sm:$0xff]  ;;  %v131_v39 = vld [vmem:[#allocation7 + $0x58] sm:$0xff] }
  0x5f   :  { %v647_v1 = vadd.f32 %v519_v53, %v262_v45  ;;  %v294_v2 = vmul.f32 %v2049_v35, %v165_v50  ;;  %v550_v3 = vmul.f32 %v2034_v10, %v421_v51  ;;  %v551_v4 = vmul.f32 %v2034_v10, %v422_v52  ;;  %v387_v40 = vld [vmem:[#allocation9 + $0x50] sm:$0xff]  ;;  %v388_v45 = vld [vmem:[#allocation9 + $0x58] sm:$0xff] }
  0x60   :  { %1670 = vmatprep.subr.bf16.mxu0 %v1162_v59  ;;  %v1178_v8 = vpack.c.bf16 %v1081_v61, %v1080_v60  ;;  %v1032_v9 = vadd.f32 %v904_v54, %v646_v62  ;;  %v936_v11 = vmul.f32 %v2038_v16, %v807_v57  ;;  %v937_v12 = vmul.f32 %v2038_v16, %v808_v58  ;;  %v773_v46 = vld [vmem:[#allocation9 + $0x450] sm:$0xff]  ;;  %v774_v47 = vld [vmem:[#allocation9 + $0x458] sm:$0xff] }
  0x61   :  { %v1033_v14 = vadd.f32 %v905_v55, %v647_v1  ;;  %v678_v15 = vadd.f32 %v550_v3, %v293_v56  ;;  %v679_v17 = vadd.f32 %v551_v4, %v294_v2  ;;  %v275_v18 = vmul.f32 %v2049_v35, %v146_v63  ;;  %v162_v52 = vld [vmem:[#allocation7 + $0x150] sm:$0xff]  ;;  %v163_v57 = vld [vmem:[#allocation7 + $0x158] sm:$0xff] }
  0x62   :  { %1692 = vmatprep.subr.bf16.mxu1 %v1178_v8  ;;  %v276_v21 = vmul.f32 %v2049_v35, %v147_v0  ;;  %v532_v22 = vmul.f32 %v2034_v10, %v403_v5  ;;  %v533_v23 = vmul.f32 %v2034_v10, %v404_v6  ;;  %v918_v24 = vmul.f32 %v2038_v16, %v789_v7  ;;  %v419_v58 = vld [vmem:[#allocation9 + $0x150] sm:$0xff]  ;;  %v420_v59 = vld [vmem:[#allocation9 + $0x158] sm:$0xff]  ;;  %v144_v6 = vld [vmem:[#allocation7 + $0xc0] sm:$0xff] }
  0x63   :  { %v1154_v28 = vpack.c.bf16 %v1033_v14, %v1032_v9  ;;  %v1064_v29 = vadd.f32 %v936_v11, %v678_v15  ;;  %v1065_v30 = vadd.f32 %v937_v12, %v679_v17  ;;  %v919_v31 = vmul.f32 %v2038_v16, %v790_v13  ;;  %v805_v0 = vld [vmem:[#allocation9 + $0x550] sm:$0xff]  ;;  %v806_v1 = vld [vmem:[#allocation9 + $0x558] sm:$0xff]  ;;  %v145_v7 = vld [vmem:[#allocation7 + $0xc8] sm:$0xff] }
  0x64   :  { %v660_v34 = vadd.f32 %v532_v22, %v275_v18  ;;  %v661_v36 = vadd.f32 %v533_v23, %v276_v21  ;;  %v307_v37 = vmul.f32 %v2049_v35, %v178_v19  ;;  %v308_v38 = vmul.f32 %v2049_v35, %v179_v20  ;;  %v401_v13 = vld [vmem:[#allocation9 + $0xc0] sm:$0xff]  ;;  %v402_v14 = vld [vmem:[#allocation9 + $0xc8] sm:$0xff] }
  0x65   :  { %1671 = vmatpush3.bf16.msra.mxu0 %v1154_v28  ;;  %v1170_v41 = vpack.c.bf16 %v1065_v30, %v1064_v29  ;;  %v564_v42 = vmul.f32 %v2034_v10, %v435_v25  ;;  %v565_v43 = vmul.f32 %v2034_v10, %v436_v26  ;;  %v950_v44 = vmul.f32 %v2038_v16, %v821_v27  ;;  %v787_v15 = vld [vmem:[#allocation9 + $0x4c0] sm:$0xff]  ;;  %v788_v21 = vld [vmem:[#allocation9 + $0x4c8] sm:$0xff] }
  0x66   :  { %v1046_v48 = vadd.f32 %v918_v24, %v660_v34  ;;  %v1047_v49 = vadd.f32 %v919_v31, %v661_v36  ;;  %v951_v50 = vmul.f32 %v2038_v16, %v822_v32  ;;  %v259_v51 = vmul.f32 %v2049_v35, %v130_v33  ;;  %v176_v26 = vld [vmem:[#allocation7 + $0x1c0] sm:$0xff]  ;;  %v177_v27 = vld [vmem:[#allocation7 + $0x1c8] sm:$0xff] }
  0x67   :  { %1693 = vmatpush3.bf16.msra.mxu1 %v1170_v41  ;;  %v692_v53 = vadd.f32 %v564_v42, %v307_v37  ;;  %v693_v54 = vadd.f32 %v565_v43, %v308_v38  ;;  %v260_v55 = vmul.f32 %v2049_v35, %v131_v39  ;;  %v516_v56 = vmul.f32 %v2034_v10, %v387_v40  ;;  %v433_v32 = vld [vmem:[#allocation9 + $0x1c0] sm:$0xff]  ;;  %v434_v33 = vld [vmem:[#allocation9 + $0x1c8] sm:$0xff] }
  0x68   :  { %v1161_v60 = vpack.c.bf16 %v1047_v49, %v1046_v48  ;;  %v517_v61 = vmul.f32 %v2034_v10, %v388_v45  ;;  %v902_v62 = vmul.f32 %v2038_v16, %v773_v46  ;;  %v903_v63 = vmul.f32 %v2038_v16, %v774_v47  ;;  %v819_v34 = vld [vmem:[#allocation9 + $0x5c0] sm:$0xff]  ;;  %v820_v40 = vld [vmem:[#allocation9 + $0x5c8] sm:$0xff] }
  0x69   :  { %v1078_v2 = vadd.f32 %v950_v44, %v692_v53  ;;  %v1079_v3 = vadd.f32 %v951_v50, %v693_v54  ;;  %v644_v4 = vadd.f32 %v516_v56, %v259_v51  ;;  %v291_v5 = vmul.f32 %v2049_v35, %v162_v52  ;;  %v128_v41 = vld [vmem:[#allocation7 + $0x40] sm:$0xff]  ;;  %v129_v46 = vld [vmem:[#allocation7 + $0x48] sm:$0xff] }
  0x6a   :  { %1672 = vmatprep.subr.bf16.mxu0 %v1161_v60  ;;  %v645_v8 = vadd.f32 %v517_v61, %v260_v55  ;;  %v292_v9 = vmul.f32 %v2049_v35, %v163_v57  ;;  %v548_v11 = vmul.f32 %v2034_v10, %v419_v58  ;;  %v549_v12 = vmul.f32 %v2034_v10, %v420_v59  ;;  %v385_v47 = vld [vmem:[#allocation9 + $0x40] sm:$0xff]  ;;  %v386_v52 = vld [vmem:[#allocation9 + $0x48] sm:$0xff] }
  0x6b   :  { %v1177_v17 = vpack.c.bf16 %v1079_v3, %v1078_v2  ;;  %v1030_v18 = vadd.f32 %v902_v62, %v644_v4  ;;  %v934_v19 = vmul.f32 %v2038_v16, %v805_v0  ;;  %v935_v20 = vmul.f32 %v2038_v16, %v806_v1  ;;  %v771_v53 = vld [vmem:[#allocation9 + $0x440] sm:$0xff]  ;;  %v772_v54 = vld [vmem:[#allocation9 + $0x448] sm:$0xff] }
  0x6c   :  { %v1031_v22 = vadd.f32 %v903_v63, %v645_v8  ;;  %v676_v23 = vadd.f32 %v548_v11, %v291_v5  ;;  %v677_v24 = vadd.f32 %v549_v12, %v292_v9  ;;  %v273_v25 = vmul.f32 %v2049_v35, %v144_v6  ;;  %v160_v59 = vld [vmem:[#allocation7 + $0x140] sm:$0xff]  ;;  %v161_v0 = vld [vmem:[#allocation7 + $0x148] sm:$0xff] }
  0x6d   :  { %1694 = vmatprep.subr.bf16.mxu1 %v1177_v17  ;;  %v274_v28 = vmul.f32 %v2049_v35, %v145_v7  ;;  %v530_v29 = vmul.f32 %v2034_v10, %v401_v13  ;;  %v531_v30 = vmul.f32 %v2034_v10, %v402_v14  ;;  %v916_v31 = vmul.f32 %v2038_v16, %v787_v15  ;;  %v417_v1 = vld [vmem:[#allocation9 + $0x140] sm:$0xff]  ;;  %v418_v2 = vld [vmem:[#allocation9 + $0x148] sm:$0xff]  ;;  %v142_v14 = vld [vmem:[#allocation7 + $0xb0] sm:$0xff] }
  0x6e   :  { %v1153_v36 = vpack.c.bf16 %v1031_v22, %v1030_v18  ;;  %v1062_v37 = vadd.f32 %v934_v19, %v676_v23  ;;  %v1063_v38 = vadd.f32 %v935_v20, %v677_v24  ;;  %v917_v39 = vmul.f32 %v2038_v16, %v788_v21  ;;  %v803_v7 = vld [vmem:[#allocation9 + $0x540] sm:$0xff]  ;;  %v804_v8 = vld [vmem:[#allocation9 + $0x548] sm:$0xff]  ;;  %v143_v15 = vld [vmem:[#allocation7 + $0xb8] sm:$0xff] }
  0x6f   :  { %v658_v42 = vadd.f32 %v530_v29, %v273_v25  ;;  %v659_v43 = vadd.f32 %v531_v30, %v274_v28  ;;  %v305_v44 = vmul.f32 %v2049_v35, %v176_v26  ;;  %v306_v45 = vmul.f32 %v2049_v35, %v177_v27  ;;  %v399_v21 = vld [vmem:[#allocation9 + $0xb0] sm:$0xff]  ;;  %v400_v22 = vld [vmem:[#allocation9 + $0xb8] sm:$0xff] }
  0x70   :  { %1673 = vmatpush3.bf16.msra.mxu0 %v1153_v36  ;;  %v1169_v48 = vpack.c.bf16 %v1063_v38, %v1062_v37  ;;  %v562_v49 = vmul.f32 %v2034_v10, %v433_v32  ;;  %v563_v50 = vmul.f32 %v2034_v10, %v434_v33  ;;  %v948_v51 = vmul.f32 %v2038_v16, %v819_v34  ;;  %v785_v23 = vld [vmem:[#allocation9 + $0x4b0] sm:$0xff]  ;;  %v786_v28 = vld [vmem:[#allocation9 + $0x4b8] sm:$0xff] }
  0x71   :  { %v1044_v55 = vadd.f32 %v916_v31, %v658_v42  ;;  %v1045_v56 = vadd.f32 %v917_v39, %v659_v43  ;;  %v949_v57 = vmul.f32 %v2038_v16, %v820_v40  ;;  %v257_v58 = vmul.f32 %v2049_v35, %v128_v41  ;;  %v174_v33 = vld [vmem:[#allocation7 + $0x1b0] sm:$0xff]  ;;  %v175_v34 = vld [vmem:[#allocation7 + $0x1b8] sm:$0xff] }
  0x72   :  { %1695 = vmatpush3.bf16.msra.mxu1 %v1169_v48  ;;  %v690_v60 = vadd.f32 %v562_v49, %v305_v44  ;;  %v691_v61 = vadd.f32 %v563_v50, %v306_v45  ;;  %v258_v62 = vmul.f32 %v2049_v35, %v129_v46  ;;  %v514_v63 = vmul.f32 %v2034_v10, %v385_v47  ;;  %v431_v40 = vld [vmem:[#allocation9 + $0x1b0] sm:$0xff]  ;;  %v432_v41 = vld [vmem:[#allocation9 + $0x1b8] sm:$0xff] }
  0x73   :  { %v1160_v3 = vpack.c.bf16 %v1045_v56, %v1044_v55  ;;  %v515_v4 = vmul.f32 %v2034_v10, %v386_v52  ;;  %v900_v5 = vmul.f32 %v2038_v16, %v771_v53  ;;  %v901_v6 = vmul.f32 %v2038_v16, %v772_v54  ;;  %v817_v42 = vld [vmem:[#allocation9 + $0x5b0] sm:$0xff]  ;;  %v818_v47 = vld [vmem:[#allocation9 + $0x5b8] sm:$0xff] }
  0x74   :  { %v1076_v9 = vadd.f32 %v948_v51, %v690_v60  ;;  %v1077_v11 = vadd.f32 %v949_v57, %v691_v61  ;;  %v642_v12 = vadd.f32 %v514_v63, %v257_v58  ;;  %v289_v13 = vmul.f32 %v2049_v35, %v160_v59  ;;  %v126_v48 = vld [vmem:[#allocation7 + $0x30] sm:$0xff]  ;;  %v127_v53 = vld [vmem:[#allocation7 + $0x38] sm:$0xff] }
  0x75   :  { %1674 = vmatprep.subr.bf16.mxu0 %v1160_v3  ;;  %v643_v17 = vadd.f32 %v515_v4, %v258_v62  ;;  %v290_v18 = vmul.f32 %v2049_v35, %v161_v0  ;;  %v546_v19 = vmul.f32 %v2034_v10, %v417_v1  ;;  %v547_v20 = vmul.f32 %v2034_v10, %v418_v2  ;;  %v383_v54 = vld [vmem:[#allocation9 + $0x30] sm:$0xff]  ;;  %v384_v59 = vld [vmem:[#allocation9 + $0x38] sm:$0xff] }
  0x76   :  { %v1176_v24 = vpack.c.bf16 %v1077_v11, %v1076_v9  ;;  %v1028_v25 = vadd.f32 %v900_v5, %v642_v12  ;;  %v932_v26 = vmul.f32 %v2038_v16, %v803_v7  ;;  %v933_v27 = vmul.f32 %v2038_v16, %v804_v8  ;;  %v769_v60 = vld [vmem:[#allocation9 + $0x430] sm:$0xff]  ;;  %v770_v61 = vld [vmem:[#allocation9 + $0x438] sm:$0xff] }
  0x77   :  { %v1029_v29 = vadd.f32 %v901_v6, %v643_v17  ;;  %v674_v30 = vadd.f32 %v546_v19, %v289_v13  ;;  %v675_v31 = vadd.f32 %v547_v20, %v290_v18  ;;  %v271_v32 = vmul.f32 %v2049_v35, %v142_v14  ;;  %v158_v2 = vld [vmem:[#allocation7 + $0x130] sm:$0xff]  ;;  %v159_v7 = vld [vmem:[#allocation7 + $0x138] sm:$0xff] }
  0x78   :  { %1696 = vmatprep.subr.bf16.mxu1 %v1176_v24  ;;  %v272_v36 = vmul.f32 %v2049_v35, %v143_v15  ;;  %v528_v37 = vmul.f32 %v2034_v10, %v399_v21  ;;  %v529_v38 = vmul.f32 %v2034_v10, %v400_v22  ;;  %v914_v39 = vmul.f32 %v2038_v16, %v785_v23  ;;  %v415_v8 = vld [vmem:[#allocation9 + $0x130] sm:$0xff]  ;;  %v416_v9 = vld [vmem:[#allocation9 + $0x138] sm:$0xff]  ;;  %v140_v22 = vld [vmem:[#allocation7 + $0xa0] sm:$0xff] }
  0x79   :  { %v1152_v43 = vpack.c.bf16 %v1029_v29, %v1028_v25  ;;  %v1060_v44 = vadd.f32 %v932_v26, %v674_v30  ;;  %v1061_v45 = vadd.f32 %v933_v27, %v675_v31  ;;  %v915_v46 = vmul.f32 %v2038_v16, %v786_v28  ;;  %v801_v15 = vld [vmem:[#allocation9 + $0x530] sm:$0xff]  ;;  %v802_v17 = vld [vmem:[#allocation9 + $0x538] sm:$0xff]  ;;  %v141_v23 = vld [vmem:[#allocation7 + $0xa8] sm:$0xff] }
  0x7a   :  { %v656_v49 = vadd.f32 %v528_v37, %v271_v32  ;;  %v657_v50 = vadd.f32 %v529_v38, %v272_v36  ;;  %v303_v51 = vmul.f32 %v2049_v35, %v174_v33  ;;  %v304_v52 = vmul.f32 %v2049_v35, %v175_v34  ;;  %v397_v28 = vld [vmem:[#allocation9 + $0xa0] sm:$0xff]  ;;  %v398_v29 = vld [vmem:[#allocation9 + $0xa8] sm:$0xff] }
  0x7b   :  { %1675 = vmatpush3.bf16.msra.mxu0 %v1152_v43  ;;  %v1168_v55 = vpack.c.bf16 %v1061_v45, %v1060_v44  ;;  %v560_v56 = vmul.f32 %v2034_v10, %v431_v40  ;;  %v561_v57 = vmul.f32 %v2034_v10, %v432_v41  ;;  %v946_v58 = vmul.f32 %v2038_v16, %v817_v42  ;;  %v783_v30 = vld [vmem:[#allocation9 + $0x4a0] sm:$0xff]  ;;  %v784_v36 = vld [vmem:[#allocation9 + $0x4a8] sm:$0xff] }
  0x7c   :  { %v1042_v62 = vadd.f32 %v914_v39, %v656_v49  ;;  %v1043_v63 = vadd.f32 %v915_v46, %v657_v50  ;;  %v947_v0 = vmul.f32 %v2038_v16, %v818_v47  ;;  %v255_v1 = vmul.f32 %v2049_v35, %v126_v48  ;;  %v172_v41 = vld [vmem:[#allocation7 + $0x1a0] sm:$0xff]  ;;  %v173_v42 = vld [vmem:[#allocation7 + $0x1a8] sm:$0xff] }
  0x7d   :  { %1697 = vmatpush3.bf16.msra.mxu1 %v1168_v55  ;;  %v688_v3 = vadd.f32 %v560_v56, %v303_v51  ;;  %v689_v4 = vadd.f32 %v561_v57, %v304_v52  ;;  %v256_v5 = vmul.f32 %v2049_v35, %v127_v53  ;;  %v512_v6 = vmul.f32 %v2034_v10, %v383_v54  ;;  %v429_v47 = vld [vmem:[#allocation9 + $0x1a0] sm:$0xff]  ;;  %v430_v48 = vld [vmem:[#allocation9 + $0x1a8] sm:$0xff] }
  0x7e   :  { %v1159_v11 = vpack.c.bf16 %v1043_v63, %v1042_v62  ;;  %v513_v12 = vmul.f32 %v2034_v10, %v384_v59  ;;  %v898_v13 = vmul.f32 %v2038_v16, %v769_v60  ;;  %v899_v14 = vmul.f32 %v2038_v16, %v770_v61  ;;  %v815_v49 = vld [vmem:[#allocation9 + $0x5a0] sm:$0xff]  ;;  %v816_v54 = vld [vmem:[#allocation9 + $0x5a8] sm:$0xff] }
  0x7f   :  { %v1074_v18 = vadd.f32 %v946_v58, %v688_v3  ;;  %v1075_v19 = vadd.f32 %v947_v0, %v689_v4  ;;  %v640_v20 = vadd.f32 %v512_v6, %v255_v1  ;;  %v287_v21 = vmul.f32 %v2049_v35, %v158_v2  ;;  %v124_v55 = vld [vmem:[#allocation7 + $0x20] sm:$0xff]  ;;  %v125_v60 = vld [vmem:[#allocation7 + $0x28] sm:$0xff] }
  0x80   :  { %1676 = vmatprep.subr.bf16.mxu0 %v1159_v11  ;;  %v641_v24 = vadd.f32 %v513_v12, %v256_v5  ;;  %v288_v25 = vmul.f32 %v2049_v35, %v159_v7  ;;  %v544_v26 = vmul.f32 %v2034_v10, %v415_v8  ;;  %v545_v27 = vmul.f32 %v2034_v10, %v416_v9  ;;  %v381_v61 = vld [vmem:[#allocation9 + $0x20] sm:$0xff]  ;;  %v382_v2 = vld [vmem:[#allocation9 + $0x28] sm:$0xff] }
  0x81   :  { %v1175_v31 = vpack.c.bf16 %v1075_v19, %v1074_v18  ;;  %v1026_v32 = vadd.f32 %v898_v13, %v640_v20  ;;  %v930_v33 = vmul.f32 %v2038_v16, %v801_v15  ;;  %v931_v34 = vmul.f32 %v2038_v16, %v802_v17  ;;  %v767_v3 = vld [vmem:[#allocation9 + $0x420] sm:$0xff]  ;;  %v768_v4 = vld [vmem:[#allocation9 + $0x428] sm:$0xff] }
  0x82   :  { %v1027_v37 = vadd.f32 %v899_v14, %v641_v24  ;;  %v672_v38 = vadd.f32 %v544_v26, %v287_v21  ;;  %v673_v39 = vadd.f32 %v545_v27, %v288_v25  ;;  %v269_v40 = vmul.f32 %v2049_v35, %v140_v22  ;;  %v156_v9 = vld [vmem:[#allocation7 + $0x120] sm:$0xff]  ;;  %v157_v15 = vld [vmem:[#allocation7 + $0x128] sm:$0xff] }
  0x83   :  { %1698 = vmatprep.subr.bf16.mxu1 %v1175_v31  ;;  %v270_v43 = vmul.f32 %v2049_v35, %v141_v23  ;;  %v526_v44 = vmul.f32 %v2034_v10, %v397_v28  ;;  %v527_v45 = vmul.f32 %v2034_v10, %v398_v29  ;;  %v912_v46 = vmul.f32 %v2038_v16, %v783_v30  ;;  %v413_v17 = vld [vmem:[#allocation9 + $0x120] sm:$0xff]  ;;  %v414_v18 = vld [vmem:[#allocation9 + $0x128] sm:$0xff]  ;;  %v138_v29 = vld [vmem:[#allocation7 + $0x90] sm:$0xff] }
  0x84   :  { %v1151_v50 = vpack.c.bf16 %v1027_v37, %v1026_v32  ;;  %v1058_v51 = vadd.f32 %v930_v33, %v672_v38  ;;  %v1059_v52 = vadd.f32 %v931_v34, %v673_v39  ;;  %v913_v53 = vmul.f32 %v2038_v16, %v784_v36  ;;  %v799_v23 = vld [vmem:[#allocation9 + $0x520] sm:$0xff]  ;;  %v800_v24 = vld [vmem:[#allocation9 + $0x528] sm:$0xff]  ;;  %v139_v30 = vld [vmem:[#allocation7 + $0x98] sm:$0xff] }
  0x85   :  { %v654_v56 = vadd.f32 %v526_v44, %v269_v40  ;;  %v655_v57 = vadd.f32 %v527_v45, %v270_v43  ;;  %v301_v58 = vmul.f32 %v2049_v35, %v172_v41  ;;  %v302_v59 = vmul.f32 %v2049_v35, %v173_v42  ;;  %v395_v36 = vld [vmem:[#allocation9 + $0x90] sm:$0xff]  ;;  %v396_v37 = vld [vmem:[#allocation9 + $0x98] sm:$0xff] }
  0x86   :  { %1677 = vmatpush3.bf16.msra.mxu0 %v1151_v50  ;;  %v1167_v62 = vpack.c.bf16 %v1059_v52, %v1058_v51  ;;  %v558_v63 = vmul.f32 %v2034_v10, %v429_v47  ;;  %v559_v0 = vmul.f32 %v2034_v10, %v430_v48  ;;  %v944_v1 = vmul.f32 %v2038_v16, %v815_v49  ;;  %v781_v38 = vld [vmem:[#allocation9 + $0x490] sm:$0xff]  ;;  %v782_v43 = vld [vmem:[#allocation9 + $0x498] sm:$0xff] }
  0x87   :  { %v1040_v5 = vadd.f32 %v912_v46, %v654_v56  ;;  %v1041_v6 = vadd.f32 %v913_v53, %v655_v57  ;;  %v945_v7 = vmul.f32 %v2038_v16, %v816_v54  ;;  %v253_v8 = vmul.f32 %v2049_v35, %v124_v55  ;;  %v170_v48 = vld [vmem:[#allocation7 + $0x190] sm:$0xff]  ;;  %v171_v49 = vld [vmem:[#allocation7 + $0x198] sm:$0xff] }
  0x88   :  { %1699 = vmatpush3.bf16.msra.mxu1 %v1167_v62  ;;  %v686_v11 = vadd.f32 %v558_v63, %v301_v58  ;;  %v687_v12 = vadd.f32 %v559_v0, %v302_v59  ;;  %v254_v13 = vmul.f32 %v2049_v35, %v125_v60  ;;  %v510_v14 = vmul.f32 %v2034_v10, %v381_v61  ;;  %v427_v54 = vld [vmem:[#allocation9 + $0x190] sm:$0xff]  ;;  %v428_v55 = vld [vmem:[#allocation9 + $0x198] sm:$0xff] }
  0x89   :  { %v1158_v19 = vpack.c.bf16 %v1041_v6, %v1040_v5  ;;  %v511_v20 = vmul.f32 %v2034_v10, %v382_v2  ;;  %v896_v21 = vmul.f32 %v2038_v16, %v767_v3  ;;  %v897_v22 = vmul.f32 %v2038_v16, %v768_v4  ;;  %v813_v56 = vld [vmem:[#allocation9 + $0x590] sm:$0xff]  ;;  %v814_v61 = vld [vmem:[#allocation9 + $0x598] sm:$0xff] }
  0x8a   :  { %v1072_v25 = vadd.f32 %v944_v1, %v686_v11  ;;  %v1073_v26 = vadd.f32 %v945_v7, %v687_v12  ;;  %v638_v27 = vadd.f32 %v510_v14, %v253_v8  ;;  %v285_v28 = vmul.f32 %v2049_v35, %v156_v9  ;;  %v122_v62 = vld [vmem:[#allocation7 + $0x10] sm:$0xff]  ;;  %v123_v3 = vld [vmem:[#allocation7 + $0x18] sm:$0xff] }
  0x8b   :  { %1678 = vmatprep.subr.bf16.mxu0 %v1158_v19  ;;  %v639_v31 = vadd.f32 %v511_v20, %v254_v13  ;;  %v286_v32 = vmul.f32 %v2049_v35, %v157_v15  ;;  %v542_v33 = vmul.f32 %v2034_v10, %v413_v17  ;;  %v543_v34 = vmul.f32 %v2034_v10, %v414_v18  ;;  %v379_v4 = vld [vmem:[#allocation9 + $0x10] sm:$0xff]  ;;  %v380_v9 = vld [vmem:[#allocation9 + $0x18] sm:$0xff] }
  0x8c   :  { %v1174_v39 = vpack.c.bf16 %v1073_v26, %v1072_v25  ;;  %v1024_v40 = vadd.f32 %v896_v21, %v638_v27  ;;  %v928_v41 = vmul.f32 %v2038_v16, %v799_v23  ;;  %v929_v42 = vmul.f32 %v2038_v16, %v800_v24  ;;  %v765_v11 = vld [vmem:[#allocation9 + $0x410] sm:$0xff]  ;;  %v766_v12 = vld [vmem:[#allocation9 + $0x418] sm:$0xff] }
  0x8d   :  { %v1025_v44 = vadd.f32 %v897_v22, %v639_v31  ;;  %v670_v45 = vadd.f32 %v542_v33, %v285_v28  ;;  %v671_v46 = vadd.f32 %v543_v34, %v286_v32  ;;  %v267_v47 = vmul.f32 %v2049_v35, %v138_v29  ;;  %v154_v18 = vld [vmem:[#allocation7 + $0x110] sm:$0xff]  ;;  %v155_v23 = vld [vmem:[#allocation7 + $0x118] sm:$0xff] }
  0x8e   :  { %1700 = vmatprep.subr.bf16.mxu1 %v1174_v39  ;;  %v268_v50 = vmul.f32 %v2049_v35, %v139_v30  ;;  %v524_v51 = vmul.f32 %v2034_v10, %v395_v36  ;;  %v525_v52 = vmul.f32 %v2034_v10, %v396_v37  ;;  %v910_v53 = vmul.f32 %v2038_v16, %v781_v38  ;;  %v411_v24 = vld [vmem:[#allocation9 + $0x110] sm:$0xff]  ;;  %v412_v25 = vld [vmem:[#allocation9 + $0x118] sm:$0xff]  ;;  %v136_v37 = vld [vmem:[#allocation7 + $0x80] sm:$0xff] }
  0x8f   :  { %v1150_v57 = vpack.c.bf16 %v1025_v44, %v1024_v40  ;;  %v1056_v58 = vadd.f32 %v928_v41, %v670_v45  ;;  %v1057_v59 = vadd.f32 %v929_v42, %v671_v46  ;;  %v911_v60 = vmul.f32 %v2038_v16, %v782_v43  ;;  %v797_v30 = vld [vmem:[#allocation9 + $0x510] sm:$0xff]  ;;  %v798_v31 = vld [vmem:[#allocation9 + $0x518] sm:$0xff]  ;;  %v137_v38 = vld [vmem:[#allocation7 + $0x88] sm:$0xff] }
  0x90   :  { %v652_v63 = vadd.f32 %v524_v51, %v267_v47  ;;  %v653_v0 = vadd.f32 %v525_v52, %v268_v50  ;;  %v299_v1 = vmul.f32 %v2049_v35, %v170_v48  ;;  %v300_v2 = vmul.f32 %v2049_v35, %v171_v49  ;;  %v393_v43 = vld [vmem:[#allocation9 + $0x80] sm:$0xff]  ;;  %v394_v44 = vld [vmem:[#allocation9 + $0x88] sm:$0xff] }
  0x91   :  { %1679 = vmatpush3.bf16.msra.mxu0 %v1150_v57  ;;  %v1166_v5 = vpack.c.bf16 %v1057_v59, %v1056_v58  ;;  %v556_v6 = vmul.f32 %v2034_v10, %v427_v54  ;;  %v557_v7 = vmul.f32 %v2034_v10, %v428_v55  ;;  %v942_v8 = vmul.f32 %v2038_v16, %v813_v56  ;;  %v779_v45 = vld [vmem:[#allocation9 + $0x480] sm:$0xff]  ;;  %v780_v50 = vld [vmem:[#allocation9 + $0x488] sm:$0xff] }
  0x92   :  { %v1038_v13 = vadd.f32 %v910_v53, %v652_v63  ;;  %v1039_v14 = vadd.f32 %v911_v60, %v653_v0  ;;  %v943_v15 = vmul.f32 %v2038_v16, %v814_v61  ;;  %v251_v17 = vmul.f32 %v2049_v35, %v122_v62  ;;  %v168_v55 = vld [vmem:[#allocation7 + $0x180] sm:$0xff]  ;;  %v169_v56 = vld [vmem:[#allocation7 + $0x188] sm:$0xff] }
  0x93   :  { %1701 = vmatpush3.bf16.msra.mxu1 %v1166_v5  ;;  %v684_v19 = vadd.f32 %v556_v6, %v299_v1  ;;  %v685_v20 = vadd.f32 %v557_v7, %v300_v2  ;;  %v252_v21 = vmul.f32 %v2049_v35, %v123_v3  ;;  %v508_v22 = vmul.f32 %v2034_v10, %v379_v4  ;;  %v425_v61 = vld [vmem:[#allocation9 + $0x180] sm:$0xff]  ;;  %v426_v62 = vld [vmem:[#allocation9 + $0x188] sm:$0xff] }
  0x94   :  { %v1157_v26 = vpack.c.bf16 %v1039_v14, %v1038_v13  ;;  %v509_v27 = vmul.f32 %v2034_v10, %v380_v9  ;;  %v894_v28 = vmul.f32 %v2038_v16, %v765_v11  ;;  %v895_v29 = vmul.f32 %v2038_v16, %v766_v12  ;;  %v811_v63 = vld [vmem:[#allocation9 + $0x580] sm:$0xff]  ;;  %v812_v4 = vld [vmem:[#allocation9 + $0x588] sm:$0xff] }
  0x95   :  { %v1070_v32 = vadd.f32 %v942_v8, %v684_v19  ;;  %v1071_v33 = vadd.f32 %v943_v15, %v685_v20  ;;  %v636_v34 = vadd.f32 %v508_v22, %v251_v17  ;;  %v283_v36 = vmul.f32 %v2049_v35, %v154_v18  ;;  %v120_v5 = vld [vmem:[#allocation7] sm:$0xff]  ;;  %v121_v11 = vld [vmem:[#allocation7 + $0x8] sm:$0xff] }
  0x96   :  { %1680 = vmatprep.subr.bf16.mxu0 %v1157_v26  ;;  %v637_v39 = vadd.f32 %v509_v27, %v252_v21  ;;  %v284_v40 = vmul.f32 %v2049_v35, %v155_v23  ;;  %v540_v41 = vmul.f32 %v2034_v10, %v411_v24  ;;  %v541_v42 = vmul.f32 %v2034_v10, %v412_v25  ;;  %v377_v12 = vld [vmem:[#allocation9] sm:$0xff]  ;;  %v378_v18 = vld [vmem:[#allocation9 + $0x8] sm:$0xff] }
  0x97   :  { %v1173_v46 = vpack.c.bf16 %v1071_v33, %v1070_v32  ;;  %v1022_v47 = vadd.f32 %v894_v28, %v636_v34  ;;  %v926_v48 = vmul.f32 %v2038_v16, %v797_v30  ;;  %v927_v49 = vmul.f32 %v2038_v16, %v798_v31  ;;  %v763_v19 = vld [vmem:[#allocation9 + $0x400] sm:$0xff]  ;;  %v764_v20 = vld [vmem:[#allocation9 + $0x408] sm:$0xff] }
  0x98   :  { %v1023_v51 = vadd.f32 %v895_v29, %v637_v39  ;;  %v668_v52 = vadd.f32 %v540_v41, %v283_v36  ;;  %v669_v53 = vadd.f32 %v541_v42, %v284_v40  ;;  %v265_v54 = vmul.f32 %v2049_v35, %v136_v37  ;;  %v152_v25 = vld [vmem:[#allocation7 + $0x100] sm:$0xff]  ;;  %v153_v30 = vld [vmem:[#allocation7 + $0x108] sm:$0xff] }
  0x99   :  { %1702 = vmatprep.subr.bf16.mxu1 %v1173_v46  ;;  %v266_v57 = vmul.f32 %v2049_v35, %v137_v38  ;;  %v522_v58 = vmul.f32 %v2034_v10, %v393_v43  ;;  %v523_v59 = vmul.f32 %v2034_v10, %v394_v44  ;;  %v908_v60 = vmul.f32 %v2038_v16, %v779_v45  ;;  %v409_v31 = vld [vmem:[#allocation9 + $0x100] sm:$0xff]  ;;  %v410_v32 = vld [vmem:[#allocation9 + $0x108] sm:$0xff] }
  0x9a   :  { %v1149_v0 = vpack.c.bf16 %v1023_v51, %v1022_v47  ;;  %v1054_v1 = vadd.f32 %v926_v48, %v668_v52  ;;  %v1055_v2 = vadd.f32 %v927_v49, %v669_v53  ;;  %v909_v3 = vmul.f32 %v2038_v16, %v780_v50  ;;  %v795_v38 = vld [vmem:[#allocation9 + $0x500] sm:$0xff]  ;;  %v796_v39 = vld [vmem:[#allocation9 + $0x508] sm:$0xff]  ;;  %v214_v52 = vld [vmem:[#allocation7 + $0x2f0] sm:$0xff] }
  0x9b   :  { %v650_v6 = vadd.f32 %v522_v58, %v265_v54  ;;  %v651_v7 = vadd.f32 %v523_v59, %v266_v57  ;;  %v297_v8 = vmul.f32 %v2049_v35, %v168_v55  ;;  %v298_v9 = vmul.f32 %v2049_v35, %v169_v56  ;;  %v2227_v44 = vld [vmem:[#allocation6] sm:$0xff]  ;;  %v2234_v50 = vld [vmem:[#allocation6 + $0x8] sm:$0xff]  ;;  %v215_v57 = vld [vmem:[#allocation7 + $0x2f8] sm:$0xff] }
  0x9c   :  { %1681 = vmatpush3.bf16.msra.mxu0 %v1149_v0  ;;  %v1165_v13 = vpack.c.bf16 %v1055_v2, %v1054_v1  ;;  %v554_v14 = vmul.f32 %v2034_v10, %v425_v61  ;;  %v555_v15 = vmul.f32 %v2034_v10, %v426_v62  ;;  %v940_v17 = vmul.f32 %v2038_v16, %v811_v63  ;;  %v2229_v45 = vld [vmem:[#allocation6 + $0x20] sm:$0xff]  ;;  %v2236_v51 = vld [vmem:[#allocation6 + $0x28] sm:$0xff]  ;;  %v471_v62 = vld [vmem:[#allocation9 + $0x2f0] sm:$0xff] }
  0x9d   :  { %v1036_v21 = vadd.f32 %v908_v60, %v650_v6  ;;  %v1037_v22 = vadd.f32 %v909_v3, %v651_v7  ;;  %v941_v23 = vmul.f32 %v2038_v16, %v812_v4  ;;  %v249_v24 = vmul.f32 %v2049_v35, %v120_v5  ;;  %v472_v63 = vld [vmem:[#allocation9 + $0x2f8] sm:$0xff]  ;;  %v857_v0 = vld [vmem:[#allocation9 + $0x6f0] sm:$0xff] }
  0x9e   :  { %1703 = vmatpush3.bf16.msra.mxu1 %v1165_v13  ;;  %v682_v26 = vadd.f32 %v554_v14, %v297_v8  ;;  %v683_v27 = vadd.f32 %v555_v15, %v298_v9  ;;  %v250_v28 = vmul.f32 %v2049_v35, %v121_v11  ;;  %v506_v29 = vmul.f32 %v2034_v10, %v377_v12  ;;  %v858_v5 = vld [vmem:[#allocation9 + $0x6f8] sm:$0xff]  ;;  %v246_v6 = vld [vmem:[#allocation7 + $0x3f0] sm:$0xff] }
  0x9f   :  { %v1156_v33 = vpack.c.bf16 %v1037_v22, %v1036_v21  ;;  %v507_v34 = vmul.f32 %v2034_v10, %v378_v18  ;;  %v892_v36 = vmul.f32 %v2038_v16, %v763_v19  ;;  %v893_v37 = vmul.f32 %v2038_v16, %v764_v20  ;;  %v247_v7 = vld [vmem:[#allocation7 + $0x3f8] sm:$0xff]  ;;  %v503_v13 = vld [vmem:[#allocation9 + $0x3f0] sm:$0xff] }
  0xa0   :  { %v1068_v40 = vadd.f32 %v940_v17, %v682_v26  ;;  %v1069_v41 = vadd.f32 %v941_v23, %v683_v27  ;;  %v634_v42 = vadd.f32 %v506_v29, %v249_v24  ;;  %v281_v43 = vmul.f32 %v2049_v35, %v152_v25  ;;  %v504_v14 = vld [vmem:[#allocation9 + $0x3f8] sm:$0xff]  ;;  %v889_v15 = vld [vmem:[#allocation9 + $0x7f0] sm:$0xff] }
  0xa1   :  { %1682 = vmatprep.subr.bf16.mxu0 %v1156_v33  ;;  %v635_v46 = vadd.f32 %v507_v34, %v250_v28  ;;  %v282_v47 = vmul.f32 %v2049_v35, %v153_v30  ;;  %v538_v48 = vmul.f32 %v2034_v10, %v409_v31  ;;  %v539_v49 = vmul.f32 %v2034_v10, %v410_v32  ;;  %v890_v20 = vld [vmem:[#allocation9 + $0x7f8] sm:$0xff]  ;;  %v198_v21 = vld [vmem:[#allocation7 + $0x270] sm:$0xff] }
  0xa2   :  { %v1172_v53 = vpack.c.bf16 %v1069_v41, %v1068_v40  ;;  %v1020_v54 = vadd.f32 %v892_v36, %v634_v42  ;;  %v924_v55 = vmul.f32 %v2038_v16, %v795_v38  ;;  %v925_v56 = vmul.f32 %v2038_v16, %v796_v39  ;;  %v199_v22 = vld [vmem:[#allocation7 + $0x278] sm:$0xff]  ;;  %v455_v27 = vld [vmem:[#allocation9 + $0x270] sm:$0xff] }
  0xa3   :  { %v1021_v58 = vadd.f32 %v893_v37, %v635_v46  ;;  %v666_v59 = vadd.f32 %v538_v48, %v281_v43  ;;  %v667_v60 = vadd.f32 %v539_v49, %v282_v47  ;;  %v1660_v61 = vcombine.low %v2227_v44, %v2229_v45  ;;  %v456_v32 = vld [vmem:[#allocation9 + $0x278] sm:$0xff]  ;;  %v841_v33 = vld [vmem:[#allocation9 + $0x670] sm:$0xff] }
  0xa4   :  { %1704 = vmatprep.subr.bf16.mxu1 %v1172_v53  ;;  %v1661_v1 = vcombine.high %v2227_v44, %v2229_v45  ;;  %v1662_v2 = vcombine.low %v2234_v50, %v2236_v51  ;;  %v1663_v3 = vcombine.high %v2234_v50, %v2236_v51  ;;  %v343_v4 = vmul.f32 %v2049_v35, %v214_v52  ;;  %v842_v34 = vld [vmem:[#allocation9 + $0x678] sm:$0xff]  ;;  %v230_v40 = vld [vmem:[#allocation7 + $0x370] sm:$0xff] }
  0xa5   :  { %v1148_v8 = vpack.c.bf16 %v1021_v58, %v1020_v54  ;;  %v1052_v9 = vadd.f32 %v924_v55, %v666_v59  ;;  %v1053_v11 = vadd.f32 %v925_v56, %v667_v60  ;;  %v344_v12 = vmul.f32 %v2049_v35, %v215_v57  ;;  %v231_v45 = vld [vmem:[#allocation7 + $0x378] sm:$0xff]  ;;  %v487_v46 = vld [vmem:[#allocation9 + $0x370] sm:$0xff]  ;;  %v212_v58 = vld [vmem:[#allocation7 + $0x2e0] sm:$0xff] }
  0xa6   :  { %1453 = vmatprep.mubr.bf16.mxu0 %v1661_v1  ;;  %1494 = vmatprep.mubr.bf16.mxu1 %v1663_v3  ;;  %v600_v17 = vmul.f32 %v2034_v10, %v471_v62  ;;  %v601_v18 = vmul.f32 %v2034_v10, %v472_v63  ;;  %v986_v19 = vmul.f32 %v2038_v16, %v857_v0  ;;  %v488_v51 = vld [vmem:[#allocation9 + $0x378] sm:$0xff]  ;;  %v873_v52 = vld [vmem:[#allocation9 + $0x770] sm:$0xff]  ;;  %v213_v63 = vld [vmem:[#allocation7 + $0x2e8] sm:$0xff] }
  0xa7   :  { %1683 = vmatpush3.bf16.msra.mxu0 %v1148_v8  ;;  %v1164_v23 = vpack.c.bf16 %v1053_v11, %v1052_v9  ;;  %v987_v24 = vmul.f32 %v2038_v16, %v858_v5  ;;  %v375_v25 = vmul.f32 %v2049_v35, %v246_v6  ;;  %v376_v26 = vmul.f32 %v2049_v35, %v247_v7  ;;  %v874_v53 = vld [vmem:[#allocation9 + $0x778] sm:$0xff]  ;;  %v469_v0 = vld [vmem:[#allocation9 + $0x2e0] sm:$0xff]  ;;  %v470_v1 = vld [vmem:[#allocation9 + $0x2e8] sm:$0xff] }
  0xa8   :  { %v728_v28 = vadd.f32 %v600_v17, %v343_v4  ;;  %v729_v29 = vadd.f32 %v601_v18, %v344_v12  ;;  %v632_v30 = vmul.f32 %v2034_v10, %v503_v13  ;;  %v633_v31 = vmul.f32 %v2034_v10, %v504_v14  ;;  %v855_v6 = vld [vmem:[#allocation9 + $0x6e0] sm:$0xff]  ;;  %v856_v7 = vld [vmem:[#allocation9 + $0x6e8] sm:$0xff] }
  0xa9   :  { %1705 = vmatpush3.bf16.msra.mxu1 %v1164_v23  ;;  %v1018_v36 = vmul.f32 %v2038_v16, %v889_v15  ;;  %v1019_v37 = vmul.f32 %v2038_v16, %v890_v20  ;;  %v327_v38 = vmul.f32 %v2049_v35, %v198_v21  ;;  %v328_v39 = vmul.f32 %v2049_v35, %v199_v22  ;;  %v244_v13 = vld [vmem:[#allocation7 + $0x3e0] sm:$0xff]  ;;  %v245_v14 = vld [vmem:[#allocation7 + $0x3e8] sm:$0xff] }
  0xaa   :  { %1454 = vmatmul.mubr.bf16.vlgmr.msra.gmra.mxu0 %v1660_v61  ;;  %v1114_v41 = vadd.f32 %v986_v19, %v728_v28  ;;  %v1115_v42 = vadd.f32 %v987_v24, %v729_v29  ;;  %v760_v43 = vadd.f32 %v632_v30, %v375_v25  ;;  %v761_v44 = vadd.f32 %v633_v31, %v376_v26  ;;  %v501_v20 = vld [vmem:[#allocation9 + $0x3e0] sm:$0xff]  ;;  %v502_v21 = vld [vmem:[#allocation9 + $0x3e8] sm:$0xff] }
  0xab   :  { %v584_v47 = vmul.f32 %v2034_v10, %v455_v27  ;;  %v585_v48 = vmul.f32 %v2034_v10, %v456_v32  ;;  %v970_v49 = vmul.f32 %v2038_v16, %v841_v33  ;;  %v971_v50 = vmul.f32 %v2038_v16, %v842_v34  ;;  %v887_v22 = vld [vmem:[#allocation9 + $0x7e0] sm:$0xff]  ;;  %v888_v27 = vld [vmem:[#allocation9 + $0x7e8] sm:$0xff] }
  0xac   :  { %1495 = vmatmul.mubr.bf16.vlgmr.msra.gmra.mxu1 %v1662_v2  ;;  %v1195_v54 = vpack.c.bf16 %v1115_v42, %v1114_v41  ;;  %v1146_v55 = vadd.f32 %v1018_v36, %v760_v43  ;;  %v1147_v56 = vadd.f32 %v1019_v37, %v761_v44  ;;  %v359_v57 = vmul.f32 %v2049_v35, %v230_v40  ;;  %v196_v32 = vld [vmem:[#allocation7 + $0x260] sm:$0xff]  ;;  %v197_v33 = vld [vmem:[#allocation7 + $0x268] sm:$0xff] }
  0xad   :  { %v712_v59 = vadd.f32 %v584_v47, %v327_v38  ;;  %v713_v60 = vadd.f32 %v585_v48, %v328_v39  ;;  %v360_v61 = vmul.f32 %v2049_v35, %v231_v45  ;;  %v616_v62 = vmul.f32 %v2034_v10, %v487_v46  ;;  %v453_v39 = vld [vmem:[#allocation9 + $0x260] sm:$0xff]  ;;  %v454_v40 = vld [vmem:[#allocation9 + $0x268] sm:$0xff] }
  0xae   :  { %1712 = vmatprep.subr.bf16.mxu0 %v1195_v54  ;;  %v1211_v3 = vpack.c.bf16 %v1147_v56, %v1146_v55  ;;  %v617_v4 = vmul.f32 %v2034_v10, %v488_v51  ;;  %v1002_v2 = vmul.f32 %v2038_v16, %v873_v52  ;;  %v1003_v5 = vmul.f32 %v2038_v16, %v874_v53  ;;  %v839_v41 = vld [vmem:[#allocation9 + $0x660] sm:$0xff]  ;;  %v840_v46 = vld [vmem:[#allocation9 + $0x668] sm:$0xff] }
  0xaf   :  { %v1098_v8 = vadd.f32 %v970_v49, %v712_v59  ;;  %v1099_v9 = vadd.f32 %v971_v50, %v713_v60  ;;  %v744_v11 = vadd.f32 %v616_v62, %v359_v57  ;;  %v341_v12 = vmul.f32 %v2049_v35, %v212_v58  ;;  %v228_v47 = vld [vmem:[#allocation7 + $0x360] sm:$0xff]  ;;  %v229_v52 = vld [vmem:[#allocation7 + $0x368] sm:$0xff] }
  0xb0   :  { %1734 = vmatprep.subr.bf16.mxu1 %v1211_v3  ;;  %v745_v15 = vadd.f32 %v617_v4, %v360_v61  ;;  %v342_v17 = vmul.f32 %v2049_v35, %v213_v63  ;;  %v598_v18 = vmul.f32 %v2034_v10, %v469_v0  ;;  %v599_v19 = vmul.f32 %v2034_v10, %v470_v1  ;;  %v485_v53 = vld [vmem:[#allocation9 + $0x360] sm:$0xff]  ;;  %v486_v58 = vld [vmem:[#allocation9 + $0x368] sm:$0xff]  ;;  %v210_v1 = vld [vmem:[#allocation7 + $0x2d0] sm:$0xff] }
  0xb1   :  { %v1187_v23 = vpack.c.bf16 %v1099_v9, %v1098_v8  ;;  %v1130_v24 = vadd.f32 %v1002_v2, %v744_v11  ;;  %v984_v25 = vmul.f32 %v2038_v16, %v855_v6  ;;  %v985_v26 = vmul.f32 %v2038_v16, %v856_v7  ;;  %v871_v59 = vld [vmem:[#allocation9 + $0x760] sm:$0xff]  ;;  %v872_v60 = vld [vmem:[#allocation9 + $0x768] sm:$0xff]  ;;  %v211_v6 = vld [vmem:[#allocation7 + $0x2d8] sm:$0xff] }
  0xb2   :  { %v1131_v28 = vadd.f32 %v1003_v5, %v745_v15  ;;  %v726_v29 = vadd.f32 %v598_v18, %v341_v12  ;;  %v727_v30 = vadd.f32 %v599_v19, %v342_v17  ;;  %v373_v31 = vmul.f32 %v2049_v35, %v244_v13  ;;  %v467_v7 = vld [vmem:[#allocation9 + $0x2d0] sm:$0xff]  ;;  %v468_v8 = vld [vmem:[#allocation9 + $0x2d8] sm:$0xff] }
  0xb3   :  { %1713 = vmatpush3.bf16.msra.mxu0 %v1187_v23  ;;  %v374_v34 = vmul.f32 %v2049_v35, %v245_v14  ;;  %v630_v36 = vmul.f32 %v2034_v10, %v501_v20  ;;  %v631_v37 = vmul.f32 %v2034_v10, %v502_v21  ;;  %v1016_v38 = vmul.f32 %v2038_v16, %v887_v22  ;;  %v853_v14 = vld [vmem:[#allocation9 + $0x6d0] sm:$0xff]  ;;  %v854_v15 = vld [vmem:[#allocation9 + $0x6d8] sm:$0xff] }
  0xb4   :  { %v1203_v42 = vpack.c.bf16 %v1131_v28, %v1130_v24  ;;  %v1112_v43 = vadd.f32 %v984_v25, %v726_v29  ;;  %v1113_v44 = vadd.f32 %v985_v26, %v727_v30  ;;  %v1017_v45 = vmul.f32 %v2038_v16, %v888_v27  ;;  %v242_v21 = vld [vmem:[#allocation7 + $0x3d0] sm:$0xff]  ;;  %v243_v22 = vld [vmem:[#allocation7 + $0x3d8] sm:$0xff] }
  0xb5   :  { %v758_v48 = vadd.f32 %v630_v36, %v373_v31  ;;  %v759_v49 = vadd.f32 %v631_v37, %v374_v34  ;;  %v325_v50 = vmul.f32 %v2049_v35, %v196_v32  ;;  %v326_v51 = vmul.f32 %v2049_v35, %v197_v33  ;;  %v499_v27 = vld [vmem:[#allocation9 + $0x3d0] sm:$0xff]  ;;  %v500_v28 = vld [vmem:[#allocation9 + $0x3d8] sm:$0xff] }
  0xb6   :  { %1735 = vmatpush3.bf16.msra.mxu1 %v1203_v42  ;;  %v1194_v54 = vpack.c.bf16 %v1113_v44, %v1112_v43  ;;  %v582_v55 = vmul.f32 %v2034_v10, %v453_v39  ;;  %v583_v56 = vmul.f32 %v2034_v10, %v454_v40  ;;  %v968_v57 = vmul.f32 %v2038_v16, %v839_v41  ;;  %v885_v29 = vld [vmem:[#allocation9 + $0x7d0] sm:$0xff]  ;;  %v886_v34 = vld [vmem:[#allocation9 + $0x7d8] sm:$0xff] }
  0xb7   :  { %v1144_v61 = vadd.f32 %v1016_v38, %v758_v48  ;;  %v1145_v62 = vadd.f32 %v1017_v45, %v759_v49  ;;  %v969_v63 = vmul.f32 %v2038_v16, %v840_v46  ;;  %v357_v0 = vmul.f32 %v2049_v35, %v228_v47  ;;  %v194_v40 = vld [vmem:[#allocation7 + $0x250] sm:$0xff]  ;;  %v195_v41 = vld [vmem:[#allocation7 + $0x258] sm:$0xff] }
  0xb8   :  { %1714 = vmatprep.subr.bf16.mxu0 %v1194_v54  ;;  %v710_v3 = vadd.f32 %v582_v55, %v325_v50  ;;  %v711_v4 = vadd.f32 %v583_v56, %v326_v51  ;;  %v358_v2 = vmul.f32 %v2049_v35, %v229_v52  ;;  %v614_v5 = vmul.f32 %v2034_v10, %v485_v53  ;;  %v451_v46 = vld [vmem:[#allocation9 + $0x250] sm:$0xff]  ;;  %v452_v47 = vld [vmem:[#allocation9 + $0x258] sm:$0xff] }
  0xb9   :  { %v1210_v9 = vpack.c.bf16 %v1145_v62, %v1144_v61  ;;  %v615_v11 = vmul.f32 %v2034_v10, %v486_v58  ;;  %v1000_v12 = vmul.f32 %v2038_v16, %v871_v59  ;;  %v1001_v13 = vmul.f32 %v2038_v16, %v872_v60  ;;  %v837_v48 = vld [vmem:[#allocation9 + $0x650] sm:$0xff]  ;;  %v838_v53 = vld [vmem:[#allocation9 + $0x658] sm:$0xff] }
  0xba   :  { %v1096_v17 = vadd.f32 %v968_v57, %v710_v3  ;;  %v1097_v18 = vadd.f32 %v969_v63, %v711_v4  ;;  %v742_v19 = vadd.f32 %v614_v5, %v357_v0  ;;  %v339_v20 = vmul.f32 %v2049_v35, %v210_v1  ;;  %v226_v54 = vld [vmem:[#allocation7 + $0x350] sm:$0xff]  ;;  %v227_v59 = vld [vmem:[#allocation7 + $0x358] sm:$0xff] }
  0xbb   :  { %1736 = vmatprep.subr.bf16.mxu1 %v1210_v9  ;;  %v743_v23 = vadd.f32 %v615_v11, %v358_v2  ;;  %v340_v24 = vmul.f32 %v2049_v35, %v211_v6  ;;  %v596_v25 = vmul.f32 %v2034_v10, %v467_v7  ;;  %v597_v26 = vmul.f32 %v2034_v10, %v468_v8  ;;  %v483_v60 = vld [vmem:[#allocation9 + $0x350] sm:$0xff]  ;;  %v484_v1 = vld [vmem:[#allocation9 + $0x358] sm:$0xff]  ;;  %v208_v8 = vld [vmem:[#allocation7 + $0x2c0] sm:$0xff] }
  0xbc   :  { %v1186_v30 = vpack.c.bf16 %v1097_v18, %v1096_v17  ;;  %v1128_v31 = vadd.f32 %v1000_v12, %v742_v19  ;;  %v982_v32 = vmul.f32 %v2038_v16, %v853_v14  ;;  %v983_v33 = vmul.f32 %v2038_v16, %v854_v15  ;;  %v869_v3 = vld [vmem:[#allocation9 + $0x750] sm:$0xff]  ;;  %v870_v4 = vld [vmem:[#allocation9 + $0x758] sm:$0xff]  ;;  %v209_v14 = vld [vmem:[#allocation7 + $0x2c8] sm:$0xff] }
  0xbd   :  { %v1129_v36 = vadd.f32 %v1001_v13, %v743_v23  ;;  %v724_v37 = vadd.f32 %v596_v25, %v339_v20  ;;  %v725_v38 = vadd.f32 %v597_v26, %v340_v24  ;;  %v371_v39 = vmul.f32 %v2049_v35, %v242_v21  ;;  %v465_v15 = vld [vmem:[#allocation9 + $0x2c0] sm:$0xff]  ;;  %v466_v17 = vld [vmem:[#allocation9 + $0x2c8] sm:$0xff] }
  0xbe   :  { %1715 = vmatpush3.bf16.msra.mxu0 %v1186_v30  ;;  %v372_v42 = vmul.f32 %v2049_v35, %v243_v22  ;;  %v628_v43 = vmul.f32 %v2034_v10, %v499_v27  ;;  %v629_v44 = vmul.f32 %v2034_v10, %v500_v28  ;;  %v1014_v45 = vmul.f32 %v2038_v16, %v885_v29  ;;  %v851_v22 = vld [vmem:[#allocation9 + $0x6c0] sm:$0xff]  ;;  %v852_v23 = vld [vmem:[#allocation9 + $0x6c8] sm:$0xff] }
  0xbf   :  { %v1202_v49 = vpack.c.bf16 %v1129_v36, %v1128_v31  ;;  %v1110_v50 = vadd.f32 %v982_v32, %v724_v37  ;;  %v1111_v51 = vadd.f32 %v983_v33, %v725_v38  ;;  %v1015_v52 = vmul.f32 %v2038_v16, %v886_v34  ;;  %v240_v28 = vld [vmem:[#allocation7 + $0x3c0] sm:$0xff]  ;;  %v241_v29 = vld [vmem:[#allocation7 + $0x3c8] sm:$0xff] }
  0xc0   :  { %v756_v55 = vadd.f32 %v628_v43, %v371_v39  ;;  %v757_v56 = vadd.f32 %v629_v44, %v372_v42  ;;  %v323_v57 = vmul.f32 %v2049_v35, %v194_v40  ;;  %v324_v58 = vmul.f32 %v2049_v35, %v195_v41  ;;  %v497_v34 = vld [vmem:[#allocation9 + $0x3c0] sm:$0xff]  ;;  %v498_v36 = vld [vmem:[#allocation9 + $0x3c8] sm:$0xff] }
  0xc1   :  { %1737 = vmatpush3.bf16.msra.mxu1 %v1202_v49  ;;  %v1193_v61 = vpack.c.bf16 %v1111_v51, %v1110_v50  ;;  %v580_v62 = vmul.f32 %v2034_v10, %v451_v46  ;;  %v581_v63 = vmul.f32 %v2034_v10, %v452_v47  ;;  %v966_v0 = vmul.f32 %v2038_v16, %v837_v48  ;;  %v883_v37 = vld [vmem:[#allocation9 + $0x7c0] sm:$0xff]  ;;  %v884_v42 = vld [vmem:[#allocation9 + $0x7c8] sm:$0xff] }
  0xc2   :  { %v1142_v2 = vadd.f32 %v1014_v45, %v756_v55  ;;  %v1143_v5 = vadd.f32 %v1015_v52, %v757_v56  ;;  %v967_v6 = vmul.f32 %v2038_v16, %v838_v53  ;;  %v355_v7 = vmul.f32 %v2049_v35, %v226_v54  ;;  %v192_v47 = vld [vmem:[#allocation7 + $0x240] sm:$0xff]  ;;  %v193_v48 = vld [vmem:[#allocation7 + $0x248] sm:$0xff] }
  0xc3   :  { %1716 = vmatprep.subr.bf16.mxu0 %v1193_v61  ;;  %v708_v9 = vadd.f32 %v580_v62, %v323_v57  ;;  %v709_v11 = vadd.f32 %v581_v63, %v324_v58  ;;  %v356_v12 = vmul.f32 %v2049_v35, %v227_v59  ;;  %v612_v13 = vmul.f32 %v2034_v10, %v483_v60  ;;  %v449_v53 = vld [vmem:[#allocation9 + $0x240] sm:$0xff]  ;;  %v450_v54 = vld [vmem:[#allocation9 + $0x248] sm:$0xff] }
  0xc4   :  { %v1209_v18 = vpack.c.bf16 %v1143_v5, %v1142_v2  ;;  %v613_v19 = vmul.f32 %v2034_v10, %v484_v1  ;;  %v998_v20 = vmul.f32 %v2038_v16, %v869_v3  ;;  %v999_v21 = vmul.f32 %v2038_v16, %v870_v4  ;;  %v835_v55 = vld [vmem:[#allocation9 + $0x640] sm:$0xff]  ;;  %v836_v60 = vld [vmem:[#allocation9 + $0x648] sm:$0xff] }
  0xc5   :  { %v1094_v24 = vadd.f32 %v966_v0, %v708_v9  ;;  %v1095_v25 = vadd.f32 %v967_v6, %v709_v11  ;;  %v740_v26 = vadd.f32 %v612_v13, %v355_v7  ;;  %v337_v27 = vmul.f32 %v2049_v35, %v208_v8  ;;  %v224_v61 = vld [vmem:[#allocation7 + $0x340] sm:$0xff]  ;;  %v225_v3 = vld [vmem:[#allocation7 + $0x348] sm:$0xff] }
  0xc6   :  { %1738 = vmatprep.subr.bf16.mxu1 %v1209_v18  ;;  %v741_v30 = vadd.f32 %v613_v19, %v356_v12  ;;  %v338_v31 = vmul.f32 %v2049_v35, %v209_v14  ;;  %v594_v32 = vmul.f32 %v2034_v10, %v465_v15  ;;  %v595_v33 = vmul.f32 %v2034_v10, %v466_v17  ;;  %v481_v4 = vld [vmem:[#allocation9 + $0x340] sm:$0xff]  ;;  %v482_v8 = vld [vmem:[#allocation9 + $0x348] sm:$0xff]  ;;  %v206_v17 = vld [vmem:[#allocation7 + $0x2b0] sm:$0xff] }
  0xc7   :  { %v1185_v38 = vpack.c.bf16 %v1095_v25, %v1094_v24  ;;  %v1126_v39 = vadd.f32 %v998_v20, %v740_v26  ;;  %v980_v40 = vmul.f32 %v2038_v16, %v851_v22  ;;  %v981_v41 = vmul.f32 %v2038_v16, %v852_v23  ;;  %v867_v9 = vld [vmem:[#allocation9 + $0x740] sm:$0xff]  ;;  %v868_v11 = vld [vmem:[#allocation9 + $0x748] sm:$0xff]  ;;  %v207_v22 = vld [vmem:[#allocation7 + $0x2b8] sm:$0xff] }
  0xc8   :  { %v1127_v43 = vadd.f32 %v999_v21, %v741_v30  ;;  %v722_v44 = vadd.f32 %v594_v32, %v337_v27  ;;  %v723_v45 = vadd.f32 %v595_v33, %v338_v31  ;;  %v369_v46 = vmul.f32 %v2049_v35, %v240_v28  ;;  %v463_v23 = vld [vmem:[#allocation9 + $0x2b0] sm:$0xff]  ;;  %v464_v24 = vld [vmem:[#allocation9 + $0x2b8] sm:$0xff] }
  0xc9   :  { %1717 = vmatpush3.bf16.msra.mxu0 %v1185_v38  ;;  %v370_v49 = vmul.f32 %v2049_v35, %v241_v29  ;;  %v626_v50 = vmul.f32 %v2034_v10, %v497_v34  ;;  %v627_v51 = vmul.f32 %v2034_v10, %v498_v36  ;;  %v1012_v52 = vmul.f32 %v2038_v16, %v883_v37  ;;  %v849_v29 = vld [vmem:[#allocation9 + $0x6b0] sm:$0xff]  ;;  %v850_v30 = vld [vmem:[#allocation9 + $0x6b8] sm:$0xff] }
  0xca   :  { %v1201_v56 = vpack.c.bf16 %v1127_v43, %v1126_v39  ;;  %v1108_v57 = vadd.f32 %v980_v40, %v722_v44  ;;  %v1109_v58 = vadd.f32 %v981_v41, %v723_v45  ;;  %v1013_v59 = vmul.f32 %v2038_v16, %v884_v42  ;;  %v238_v36 = vld [vmem:[#allocation7 + $0x3b0] sm:$0xff]  ;;  %v239_v37 = vld [vmem:[#allocation7 + $0x3b8] sm:$0xff] }
  0xcb   :  { %v754_v62 = vadd.f32 %v626_v50, %v369_v46  ;;  %v755_v63 = vadd.f32 %v627_v51, %v370_v49  ;;  %v321_v0 = vmul.f32 %v2049_v35, %v192_v47  ;;  %v322_v1 = vmul.f32 %v2049_v35, %v193_v48  ;;  %v495_v42 = vld [vmem:[#allocation9 + $0x3b0] sm:$0xff]  ;;  %v496_v43 = vld [vmem:[#allocation9 + $0x3b8] sm:$0xff] }
  0xcc   :  { %1739 = vmatpush3.bf16.msra.mxu1 %v1201_v56  ;;  %v1192_v2 = vpack.c.bf16 %v1109_v58, %v1108_v57  ;;  %v578_v5 = vmul.f32 %v2034_v10, %v449_v53  ;;  %v579_v6 = vmul.f32 %v2034_v10, %v450_v54  ;;  %v964_v7 = vmul.f32 %v2038_v16, %v835_v55  ;;  %v881_v44 = vld [vmem:[#allocation9 + $0x7b0] sm:$0xff]  ;;  %v882_v49 = vld [vmem:[#allocation9 + $0x7b8] sm:$0xff] }
  0xcd   :  { %v1140_v12 = vadd.f32 %v1012_v52, %v754_v62  ;;  %v1141_v13 = vadd.f32 %v1013_v59, %v755_v63  ;;  %v965_v14 = vmul.f32 %v2038_v16, %v836_v60  ;;  %v353_v15 = vmul.f32 %v2049_v35, %v224_v61  ;;  %v190_v54 = vld [vmem:[#allocation7 + $0x230] sm:$0xff]  ;;  %v191_v55 = vld [vmem:[#allocation7 + $0x238] sm:$0xff] }
  0xce   :  { %1718 = vmatprep.subr.bf16.mxu0 %v1192_v2  ;;  %v706_v18 = vadd.f32 %v578_v5, %v321_v0  ;;  %v707_v19 = vadd.f32 %v579_v6, %v322_v1  ;;  %v354_v20 = vmul.f32 %v2049_v35, %v225_v3  ;;  %v610_v21 = vmul.f32 %v2034_v10, %v481_v4  ;;  %v447_v60 = vld [vmem:[#allocation9 + $0x230] sm:$0xff]  ;;  %v448_v61 = vld [vmem:[#allocation9 + $0x238] sm:$0xff] }
  0xcf   :  { %v1208_v25 = vpack.c.bf16 %v1141_v13, %v1140_v12  ;;  %v611_v26 = vmul.f32 %v2034_v10, %v482_v8  ;;  %v996_v27 = vmul.f32 %v2038_v16, %v867_v9  ;;  %v997_v28 = vmul.f32 %v2038_v16, %v868_v11  ;;  %v833_v62 = vld [vmem:[#allocation9 + $0x630] sm:$0xff]  ;;  %v834_v4 = vld [vmem:[#allocation9 + $0x638] sm:$0xff] }
  0xd0   :  { %v1092_v31 = vadd.f32 %v964_v7, %v706_v18  ;;  %v1093_v32 = vadd.f32 %v965_v14, %v707_v19  ;;  %v738_v33 = vadd.f32 %v610_v21, %v353_v15  ;;  %v335_v34 = vmul.f32 %v2049_v35, %v206_v17  ;;  %v222_v2 = vld [vmem:[#allocation7 + $0x330] sm:$0xff]  ;;  %v223_v9 = vld [vmem:[#allocation7 + $0x338] sm:$0xff] }
  0xd1   :  { %1740 = vmatprep.subr.bf16.mxu1 %v1208_v25  ;;  %v739_v38 = vadd.f32 %v611_v26, %v354_v20  ;;  %v336_v39 = vmul.f32 %v2049_v35, %v207_v22  ;;  %v592_v40 = vmul.f32 %v2034_v10, %v463_v23  ;;  %v593_v41 = vmul.f32 %v2034_v10, %v464_v24  ;;  %v479_v11 = vld [vmem:[#allocation9 + $0x330] sm:$0xff]  ;;  %v480_v17 = vld [vmem:[#allocation9 + $0x338] sm:$0xff]  ;;  %v204_v24 = vld [vmem:[#allocation7 + $0x2a0] sm:$0xff] }
  0xd2   :  { %v1184_v45 = vpack.c.bf16 %v1093_v32, %v1092_v31  ;;  %v1124_v46 = vadd.f32 %v996_v27, %v738_v33  ;;  %v978_v47 = vmul.f32 %v2038_v16, %v849_v29  ;;  %v979_v48 = vmul.f32 %v2038_v16, %v850_v30  ;;  %v865_v18 = vld [vmem:[#allocation9 + $0x730] sm:$0xff]  ;;  %v866_v19 = vld [vmem:[#allocation9 + $0x738] sm:$0xff]  ;;  %v205_v29 = vld [vmem:[#allocation7 + $0x2a8] sm:$0xff] }
  0xd3   :  { %v1125_v50 = vadd.f32 %v997_v28, %v739_v38  ;;  %v720_v51 = vadd.f32 %v592_v40, %v335_v34  ;;  %v721_v52 = vadd.f32 %v593_v41, %v336_v39  ;;  %v367_v53 = vmul.f32 %v2049_v35, %v238_v36  ;;  %v461_v30 = vld [vmem:[#allocation9 + $0x2a0] sm:$0xff]  ;;  %v462_v31 = vld [vmem:[#allocation9 + $0x2a8] sm:$0xff] }
  0xd4   :  { %1719 = vmatpush3.bf16.msra.mxu0 %v1184_v45  ;;  %v368_v56 = vmul.f32 %v2049_v35, %v239_v37  ;;  %v624_v57 = vmul.f32 %v2034_v10, %v495_v42  ;;  %v625_v58 = vmul.f32 %v2034_v10, %v496_v43  ;;  %v1010_v59 = vmul.f32 %v2038_v16, %v881_v44  ;;  %v847_v37 = vld [vmem:[#allocation9 + $0x6a0] sm:$0xff]  ;;  %v848_v38 = vld [vmem:[#allocation9 + $0x6a8] sm:$0xff] }
  0xd5   :  { %v1200_v63 = vpack.c.bf16 %v1125_v50, %v1124_v46  ;;  %v1106_v0 = vadd.f32 %v978_v47, %v720_v51  ;;  %v1107_v1 = vadd.f32 %v979_v48, %v721_v52  ;;  %v1011_v3 = vmul.f32 %v2038_v16, %v882_v49  ;;  %v236_v43 = vld [vmem:[#allocation7 + $0x3a0] sm:$0xff]  ;;  %v237_v44 = vld [vmem:[#allocation7 + $0x3a8] sm:$0xff] }
  0xd6   :  { %v752_v5 = vadd.f32 %v624_v57, %v367_v53  ;;  %v753_v6 = vadd.f32 %v625_v58, %v368_v56  ;;  %v319_v7 = vmul.f32 %v2049_v35, %v190_v54  ;;  %v320_v8 = vmul.f32 %v2049_v35, %v191_v55  ;;  %v493_v49 = vld [vmem:[#allocation9 + $0x3a0] sm:$0xff]  ;;  %v494_v50 = vld [vmem:[#allocation9 + $0x3a8] sm:$0xff] }
  0xd7   :  { %1741 = vmatpush3.bf16.msra.mxu1 %v1200_v63  ;;  %v1191_v12 = vpack.c.bf16 %v1107_v1, %v1106_v0  ;;  %v576_v13 = vmul.f32 %v2034_v10, %v447_v60  ;;  %v577_v14 = vmul.f32 %v2034_v10, %v448_v61  ;;  %v962_v15 = vmul.f32 %v2038_v16, %v833_v62  ;;  %v879_v51 = vld [vmem:[#allocation9 + $0x7a0] sm:$0xff]  ;;  %v880_v56 = vld [vmem:[#allocation9 + $0x7a8] sm:$0xff] }
  0xd8   :  { %v1138_v20 = vadd.f32 %v1010_v59, %v752_v5  ;;  %v1139_v21 = vadd.f32 %v1011_v3, %v753_v6  ;;  %v963_v22 = vmul.f32 %v2038_v16, %v834_v4  ;;  %v351_v23 = vmul.f32 %v2049_v35, %v222_v2  ;;  %v188_v61 = vld [vmem:[#allocation7 + $0x220] sm:$0xff]  ;;  %v189_v62 = vld [vmem:[#allocation7 + $0x228] sm:$0xff] }
  0xd9   :  { %1720 = vmatprep.subr.bf16.mxu0 %v1191_v12  ;;  %v704_v25 = vadd.f32 %v576_v13, %v319_v7  ;;  %v705_v26 = vadd.f32 %v577_v14, %v320_v8  ;;  %v352_v27 = vmul.f32 %v2049_v35, %v223_v9  ;;  %v608_v28 = vmul.f32 %v2034_v10, %v479_v11  ;;  %v445_v4 = vld [vmem:[#allocation9 + $0x220] sm:$0xff]  ;;  %v446_v2 = vld [vmem:[#allocation9 + $0x228] sm:$0xff] }
  0xda   :  { %v1207_v32 = vpack.c.bf16 %v1139_v21, %v1138_v20  ;;  %v609_v33 = vmul.f32 %v2034_v10, %v480_v17  ;;  %v994_v34 = vmul.f32 %v2038_v16, %v865_v18  ;;  %v995_v36 = vmul.f32 %v2038_v16, %v866_v19  ;;  %v831_v5 = vld [vmem:[#allocation9 + $0x620] sm:$0xff]  ;;  %v832_v11 = vld [vmem:[#allocation9 + $0x628] sm:$0xff] }
  0xdb   :  { %v1090_v39 = vadd.f32 %v962_v15, %v704_v25  ;;  %v1091_v40 = vadd.f32 %v963_v22, %v705_v26  ;;  %v736_v41 = vadd.f32 %v608_v28, %v351_v23  ;;  %v333_v42 = vmul.f32 %v2049_v35, %v204_v24  ;;  %v220_v12 = vld [vmem:[#allocation7 + $0x320] sm:$0xff]  ;;  %v221_v18 = vld [vmem:[#allocation7 + $0x328] sm:$0xff] }
  0xdc   :  { %1742 = vmatprep.subr.bf16.mxu1 %v1207_v32  ;;  %v737_v45 = vadd.f32 %v609_v33, %v352_v27  ;;  %v334_v46 = vmul.f32 %v2049_v35, %v205_v29  ;;  %v590_v47 = vmul.f32 %v2034_v10, %v461_v30  ;;  %v591_v48 = vmul.f32 %v2034_v10, %v462_v31  ;;  %v477_v19 = vld [vmem:[#allocation9 + $0x320] sm:$0xff]  ;;  %v478_v24 = vld [vmem:[#allocation9 + $0x328] sm:$0xff]  ;;  %v202_v31 = vld [vmem:[#allocation7 + $0x290] sm:$0xff] }
  0xdd   :  { %v1183_v52 = vpack.c.bf16 %v1091_v40, %v1090_v39  ;;  %v1122_v53 = vadd.f32 %v994_v34, %v736_v41  ;;  %v976_v54 = vmul.f32 %v2038_v16, %v847_v37  ;;  %v977_v55 = vmul.f32 %v2038_v16, %v848_v38  ;;  %v863_v25 = vld [vmem:[#allocation9 + $0x720] sm:$0xff]  ;;  %v864_v26 = vld [vmem:[#allocation9 + $0x728] sm:$0xff]  ;;  %v203_v37 = vld [vmem:[#allocation7 + $0x298] sm:$0xff] }
  0xde   :  { %v1123_v57 = vadd.f32 %v995_v36, %v737_v45  ;;  %v718_v58 = vadd.f32 %v590_v47, %v333_v42  ;;  %v719_v59 = vadd.f32 %v591_v48, %v334_v46  ;;  %v365_v60 = vmul.f32 %v2049_v35, %v236_v43  ;;  %v459_v38 = vld [vmem:[#allocation9 + $0x290] sm:$0xff]  ;;  %v460_v39 = vld [vmem:[#allocation9 + $0x298] sm:$0xff] }
  0xdf   :  { %1721 = vmatpush3.bf16.msra.mxu0 %v1183_v52  ;;  %v366_v63 = vmul.f32 %v2049_v35, %v237_v44  ;;  %v622_v0 = vmul.f32 %v2034_v10, %v493_v49  ;;  %v623_v1 = vmul.f32 %v2034_v10, %v494_v50  ;;  %v1008_v3 = vmul.f32 %v2038_v16, %v879_v51  ;;  %v845_v44 = vld [vmem:[#allocation9 + $0x690] sm:$0xff]  ;;  %v846_v45 = vld [vmem:[#allocation9 + $0x698] sm:$0xff] }
  0xe0   :  { %v1199_v6 = vpack.c.bf16 %v1123_v57, %v1122_v53  ;;  %v1104_v7 = vadd.f32 %v976_v54, %v718_v58  ;;  %v1105_v8 = vadd.f32 %v977_v55, %v719_v59  ;;  %v1009_v9 = vmul.f32 %v2038_v16, %v880_v56  ;;  %v234_v50 = vld [vmem:[#allocation7 + $0x390] sm:$0xff]  ;;  %v235_v51 = vld [vmem:[#allocation7 + $0x398] sm:$0xff] }
  0xe1   :  { %v750_v13 = vadd.f32 %v622_v0, %v365_v60  ;;  %v751_v14 = vadd.f32 %v623_v1, %v366_v63  ;;  %v317_v15 = vmul.f32 %v2049_v35, %v188_v61  ;;  %v318_v17 = vmul.f32 %v2049_v35, %v189_v62  ;;  %v491_v56 = vld [vmem:[#allocation9 + $0x390] sm:$0xff]  ;;  %v492_v57 = vld [vmem:[#allocation9 + $0x398] sm:$0xff] }
  0xe2   :  { %1743 = vmatpush3.bf16.msra.mxu1 %v1199_v6  ;;  %v1190_v20 = vpack.c.bf16 %v1105_v8, %v1104_v7  ;;  %v574_v21 = vmul.f32 %v2034_v10, %v445_v4  ;;  %v575_v22 = vmul.f32 %v2034_v10, %v446_v2  ;;  %v960_v23 = vmul.f32 %v2038_v16, %v831_v5  ;;  %v877_v58 = vld [vmem:[#allocation9 + $0x790] sm:$0xff]  ;;  %v878_v63 = vld [vmem:[#allocation9 + $0x798] sm:$0xff] }
  0xe3   :  { %v1136_v27 = vadd.f32 %v1008_v3, %v750_v13  ;;  %v1137_v28 = vadd.f32 %v1009_v9, %v751_v14  ;;  %v961_v29 = vmul.f32 %v2038_v16, %v832_v11  ;;  %v349_v30 = vmul.f32 %v2049_v35, %v220_v12  ;;  %v186_v2 = vld [vmem:[#allocation7 + $0x210] sm:$0xff]  ;;  %v187_v5 = vld [vmem:[#allocation7 + $0x218] sm:$0xff] }
  0xe4   :  { %1722 = vmatprep.subr.bf16.mxu0 %v1190_v20  ;;  %v702_v32 = vadd.f32 %v574_v21, %v317_v15  ;;  %v703_v33 = vadd.f32 %v575_v22, %v318_v17  ;;  %v350_v34 = vmul.f32 %v2049_v35, %v221_v18  ;;  %v606_v36 = vmul.f32 %v2034_v10, %v477_v19  ;;  %v443_v11 = vld [vmem:[#allocation9 + $0x210] sm:$0xff]  ;;  %v444_v12 = vld [vmem:[#allocation9 + $0x218] sm:$0xff] }
  0xe5   :  { %v1206_v40 = vpack.c.bf16 %v1137_v28, %v1136_v27  ;;  %v607_v41 = vmul.f32 %v2034_v10, %v478_v24  ;;  %v992_v42 = vmul.f32 %v2038_v16, %v863_v25  ;;  %v993_v43 = vmul.f32 %v2038_v16, %v864_v26  ;;  %v829_v13 = vld [vmem:[#allocation9 + $0x610] sm:$0xff]  ;;  %v830_v19 = vld [vmem:[#allocation9 + $0x618] sm:$0xff] }
  0xe6   :  { %v1088_v46 = vadd.f32 %v960_v23, %v702_v32  ;;  %v1089_v47 = vadd.f32 %v961_v29, %v703_v33  ;;  %v734_v48 = vadd.f32 %v606_v36, %v349_v30  ;;  %v331_v49 = vmul.f32 %v2049_v35, %v202_v31  ;;  %v218_v20 = vld [vmem:[#allocation7 + $0x310] sm:$0xff]  ;;  %v219_v25 = vld [vmem:[#allocation7 + $0x318] sm:$0xff] }
  0xe7   :  { %1744 = vmatprep.subr.bf16.mxu1 %v1206_v40  ;;  %v735_v52 = vadd.f32 %v607_v41, %v350_v34  ;;  %v332_v53 = vmul.f32 %v2049_v35, %v203_v37  ;;  %v588_v54 = vmul.f32 %v2034_v10, %v459_v38  ;;  %v589_v55 = vmul.f32 %v2034_v10, %v460_v39  ;;  %v475_v26 = vld [vmem:[#allocation9 + $0x310] sm:$0xff]  ;;  %v476_v31 = vld [vmem:[#allocation9 + $0x318] sm:$0xff]  ;;  %v200_v39 = vld [vmem:[#allocation7 + $0x280] sm:$0xff] }
  0xe8   :  { %v1182_v59 = vpack.c.bf16 %v1089_v47, %v1088_v46  ;;  %v1120_v60 = vadd.f32 %v992_v42, %v734_v48  ;;  %v974_v61 = vmul.f32 %v2038_v16, %v845_v44  ;;  %v975_v62 = vmul.f32 %v2038_v16, %v846_v45  ;;  %v861_v32 = vld [vmem:[#allocation9 + $0x710] sm:$0xff]  ;;  %v862_v33 = vld [vmem:[#allocation9 + $0x718] sm:$0xff]  ;;  %v201_v44 = vld [vmem:[#allocation7 + $0x288] sm:$0xff] }
  0xe9   :  { %v1121_v0 = vadd.f32 %v993_v43, %v735_v52  ;;  %v716_v1 = vadd.f32 %v588_v54, %v331_v49  ;;  %v717_v3 = vadd.f32 %v589_v55, %v332_v53  ;;  %v363_v4 = vmul.f32 %v2049_v35, %v234_v50  ;;  %v457_v45 = vld [vmem:[#allocation9 + $0x280] sm:$0xff]  ;;  %v458_v46 = vld [vmem:[#allocation9 + $0x288] sm:$0xff] }
  0xea   :  { %1723 = vmatpush3.bf16.msra.mxu0 %v1182_v59  ;;  %v364_v6 = vmul.f32 %v2049_v35, %v235_v51  ;;  %v620_v7 = vmul.f32 %v2034_v10, %v491_v56  ;;  %v621_v8 = vmul.f32 %v2034_v10, %v492_v57  ;;  %v1006_v9 = vmul.f32 %v2038_v16, %v877_v58  ;;  %v843_v51 = vld [vmem:[#allocation9 + $0x680] sm:$0xff]  ;;  %v844_v52 = vld [vmem:[#allocation9 + $0x688] sm:$0xff] }
  0xeb   :  { %v1198_v14 = vpack.c.bf16 %v1121_v0, %v1120_v60  ;;  %v1102_v15 = vadd.f32 %v974_v61, %v716_v1  ;;  %v1103_v17 = vadd.f32 %v975_v62, %v717_v3  ;;  %v1007_v18 = vmul.f32 %v2038_v16, %v878_v63  ;;  %v232_v57 = vld [vmem:[#allocation7 + $0x380] sm:$0xff]  ;;  %v233_v58 = vld [vmem:[#allocation7 + $0x388] sm:$0xff] }
  0xec   :  { %v748_v21 = vadd.f32 %v620_v7, %v363_v4  ;;  %v749_v22 = vadd.f32 %v621_v8, %v364_v6  ;;  %v315_v23 = vmul.f32 %v2049_v35, %v186_v2  ;;  %v316_v24 = vmul.f32 %v2049_v35, %v187_v5  ;;  %v489_v63 = vld [vmem:[#allocation9 + $0x380] sm:$0xff]  ;;  %v490_v0 = vld [vmem:[#allocation9 + $0x388] sm:$0xff] }
  0xed   :  { %1745 = vmatpush3.bf16.msra.mxu1 %v1198_v14  ;;  %v1189_v27 = vpack.c.bf16 %v1103_v17, %v1102_v15  ;;  %v572_v28 = vmul.f32 %v2034_v10, %v443_v11  ;;  %v573_v29 = vmul.f32 %v2034_v10, %v444_v12  ;;  %v958_v30 = vmul.f32 %v2038_v16, %v829_v13  ;;  %v875_v1 = vld [vmem:[#allocation9 + $0x780] sm:$0xff]  ;;  %v876_v6 = vld [vmem:[#allocation9 + $0x788] sm:$0xff] }
  0xee   :  { %v1134_v34 = vadd.f32 %v1006_v9, %v748_v21  ;;  %v1135_v36 = vadd.f32 %v1007_v18, %v749_v22  ;;  %v959_v37 = vmul.f32 %v2038_v16, %v830_v19  ;;  %v347_v38 = vmul.f32 %v2049_v35, %v218_v20  ;;  %v184_v12 = vld [vmem:[#allocation7 + $0x200] sm:$0xff]  ;;  %v185_v13 = vld [vmem:[#allocation7 + $0x208] sm:$0xff] }
  0xef   :  { %1724 = vmatprep.subr.bf16.mxu0 %v1189_v27  ;;  %v700_v40 = vadd.f32 %v572_v28, %v315_v23  ;;  %v701_v41 = vadd.f32 %v573_v29, %v316_v24  ;;  %v348_v42 = vmul.f32 %v2049_v35, %v219_v25  ;;  %v604_v43 = vmul.f32 %v2034_v10, %v475_v26  ;;  %v441_v19 = vld [vmem:[#allocation9 + $0x200] sm:$0xff]  ;;  %v442_v20 = vld [vmem:[#allocation9 + $0x208] sm:$0xff] }
  0xf0   :  { %v1205_v47 = vpack.c.bf16 %v1135_v36, %v1134_v34  ;;  %v605_v48 = vmul.f32 %v2034_v10, %v476_v31  ;;  %v990_v49 = vmul.f32 %v2038_v16, %v861_v32  ;;  %v991_v50 = vmul.f32 %v2038_v16, %v862_v33  ;;  %v827_v21 = vld [vmem:[#allocation9 + $0x600] sm:$0xff]  ;;  %v828_v26 = vld [vmem:[#allocation9 + $0x608] sm:$0xff] }
  0xf1   :  { %v1086_v53 = vadd.f32 %v958_v30, %v700_v40  ;;  %v1087_v54 = vadd.f32 %v959_v37, %v701_v41  ;;  %v732_v55 = vadd.f32 %v604_v43, %v347_v38  ;;  %v329_v56 = vmul.f32 %v2049_v35, %v200_v39  ;;  %v216_v27 = vld [vmem:[#allocation7 + $0x300] sm:$0xff]  ;;  %v217_v32 = vld [vmem:[#allocation7 + $0x308] sm:$0xff] }
  0xf2   :  { %1746 = vmatprep.subr.bf16.mxu1 %v1205_v47  ;;  %v733_v59 = vadd.f32 %v605_v48, %v348_v42  ;;  %v330_v60 = vmul.f32 %v2049_v35, %v201_v44  ;;  %v586_v61 = vmul.f32 %v2034_v10, %v457_v45  ;;  %v587_v62 = vmul.f32 %v2034_v10, %v458_v46  ;;  %v473_v33 = vld [vmem:[#allocation9 + $0x300] sm:$0xff]  ;;  %v474_v39 = vld [vmem:[#allocation9 + $0x308] sm:$0xff]  ;;  %v1369_v46 = vld [vmem:[#allocation6 + $0x10] sm:$0xff] }
  0xf3   :  { %v1181_v3 = vpack.c.bf16 %v1087_v54, %v1086_v53  ;;  %v1118_v4 = vadd.f32 %v990_v49, %v732_v55  ;;  %v972_v2 = vmul.f32 %v2038_v16, %v843_v51  ;;  %v973_v5 = vmul.f32 %v2038_v16, %v844_v52  ;;  %v859_v40 = vld [vmem:[#allocation9 + $0x700] sm:$0xff]  ;;  %v860_v41 = vld [vmem:[#allocation9 + $0x708] sm:$0xff]  ;;  %v1373_v51 = vld [vmem:[#allocation6 + $0x30] sm:$0xff] }
  0xf4   :  { %v1119_v7 = vadd.f32 %v991_v50, %v733_v59  ;;  %v714_v8 = vadd.f32 %v586_v61, %v329_v56  ;;  %v715_v9 = vadd.f32 %v587_v62, %v330_v60  ;;  %v361_v11 = vmul.f32 %v2049_v35, %v232_v57  ;;  %v2437_v52 = vld [vmem:[#allocation6 + $0x18] sm:$0xff] }
  0xf5   :  { %1725 = vmatpush3.bf16.msra.mxu0 %v1181_v3  ;;  %v362_v14 = vmul.f32 %v2049_v35, %v233_v58  ;;  %v618_v15 = vmul.f32 %v2034_v10, %v489_v63  ;;  %v619_v17 = vmul.f32 %v2034_v10, %v490_v0  ;;  %v1004_v18 = vmul.f32 %v2038_v16, %v875_v1  ;;  %v2439_v53 = vld [vmem:[#allocation6 + $0x38] sm:$0xff]  ;;  %v1235_v0 = vld [vmem:[#allocation10 + $0x70] sm:$0xff] }
  0xf6   :  { %v1197_v22 = vpack.c.bf16 %v1119_v7, %v1118_v4  ;;  %v1100_v23 = vadd.f32 %v972_v2, %v714_v8  ;;  %v1101_v24 = vadd.f32 %v973_v5, %v715_v9  ;;  %v1005_v25 = vmul.f32 %v2038_v16, %v876_v6  ;;  %v1236_v1 = vld [vmem:[#allocation10 + $0x78] sm:$0xff]  ;;  %v1267_v3 = vld [vmem:[#allocation12 + $0x70] sm:$0xff] }
  0xf7   :  { %v746_v28 = vadd.f32 %v618_v15, %v361_v11  ;;  %v747_v29 = vadd.f32 %v619_v17, %v362_v14  ;;  %v313_v30 = vmul.f32 %v2049_v35, %v184_v12  ;;  %v314_v31 = vmul.f32 %v2049_v35, %v185_v13  ;;  %v1268_v5 = vld [vmem:[#allocation12 + $0x78] sm:$0xff]  ;;  %v1316_v6 = vld [vmem:[#allocation12 + $0xf0] sm:$0xff]  ;;  %v1233_v11 = vld [vmem:[#allocation10 + $0x60] sm:$0xff] }
  0xf8   :  { %1747 = vmatpush3.bf16.msra.mxu1 %v1197_v22  ;;  %v1188_v34 = vpack.c.bf16 %v1101_v24, %v1100_v23  ;;  %v570_v36 = vmul.f32 %v2034_v10, %v441_v19  ;;  %v571_v37 = vmul.f32 %v2034_v10, %v442_v20  ;;  %v956_v38 = vmul.f32 %v2038_v16, %v827_v21  ;;  %v1317_v9 = vld [vmem:[#allocation12 + $0xf8] sm:$0xff]  ;;  %v1234_v15 = vld [vmem:[#allocation10 + $0x68] sm:$0xff]  ;;  %v1265_v17 = vld [vmem:[#allocation12 + $0x60] sm:$0xff] }
  0xf9   :  { %v1132_v42 = vadd.f32 %v1004_v18, %v746_v28  ;;  %v1133_v43 = vadd.f32 %v1005_v25, %v747_v29  ;;  %v957_v44 = vmul.f32 %v2038_v16, %v828_v26  ;;  %v345_v45 = vmul.f32 %v2049_v35, %v216_v27  ;;  %v1266_v22 = vld [vmem:[#allocation12 + $0x68] sm:$0xff]  ;;  %v1314_v23 = vld [vmem:[#allocation12 + $0xe0] sm:$0xff]  ;;  %v1231_v29 = vld [vmem:[#allocation10 + $0x50] sm:$0xff] }
  0xfa   :  { %1726 = vmatprep.subr.bf16.mxu0 %v1188_v34  ;;  %v698_v47 = vadd.f32 %v570_v36, %v313_v30  ;;  %v699_v48 = vadd.f32 %v571_v37, %v314_v31  ;;  %v346_v49 = vmul.f32 %v2049_v35, %v217_v32  ;;  %v602_v50 = vmul.f32 %v2034_v10, %v473_v33  ;;  %v1315_v24 = vld [vmem:[#allocation12 + $0xe8] sm:$0xff]  ;;  %v1232_v33 = vld [vmem:[#allocation10 + $0x58] sm:$0xff]  ;;  %v1263_v34 = vld [vmem:[#allocation12 + $0x50] sm:$0xff] }
  0xfb   :  { %v1204_v54 = vpack.c.bf16 %v1133_v43, %v1132_v42  ;;  %v603_v55 = vmul.f32 %v2034_v10, %v474_v39  ;;  %v988_v56 = vmul.f32 %v2038_v16, %v859_v40  ;;  %v989_v57 = vmul.f32 %v2038_v16, %v860_v41  ;;  %v1264_v36 = vld [vmem:[#allocation12 + $0x58] sm:$0xff]  ;;  %v1312_v41 = vld [vmem:[#allocation12 + $0xd0] sm:$0xff] }
  0xfc   :  { %v1084_v58 = vadd.f32 %v956_v38, %v698_v47  ;;  %v1085_v59 = vadd.f32 %v957_v44, %v699_v48  ;;  %v730_v60 = vadd.f32 %v602_v50, %v345_v45  ;;  %v1665_v62 = vcombine.high %v1369_v46, %v1373_v51  ;;  %v1313_v42 = vld [vmem:[#allocation12 + $0xd8] sm:$0xff]  ;;  %v1230_v47 = vld [vmem:[#allocation10 + $0x48] sm:$0xff] }
  0xfd   :  { %1748 = vmatprep.subr.bf16.mxu1 %v1204_v54  ;;  %v731_v61 = vadd.f32 %v603_v55, %v346_v49  ;;  %v1667_v63 = vcombine.high %v2437_v52, %v2439_v53  ;;  %v1664_v8 = vcombine.low %v1369_v46, %v1373_v51  ;;  %v1251_v12 = vmul.f32 %v1235_v0, %v2049_v35  ;;  %v1229_v46 = vld [vmem:[#allocation10 + $0x40] sm:$0xff] }
  0xfe   :  { %v1180_v4 = vpack.c.bf16 %v1085_v59, %v1084_v58  ;;  %v1116_v2 = vadd.f32 %v988_v56, %v730_v60  ;;  %1535 = vmatprep.mubr.bf16.mxu0 %v1665_v62  ;;  %v1252_v13 = vmul.f32 %v1236_v1, %v2049_v35  ;;  %v1283_v14 = vmul.f32 %v1267_v3, %v2034_v10  ;;  %v1310_v54 = vld [vmem:[#allocation12 + $0xc0] sm:$0xff]  ;;  %v1311_v59 = vld [vmem:[#allocation12 + $0xc8] sm:$0xff] }
  0xff   :  { %v1117_v7 = vadd.f32 %v989_v57, %v731_v61  ;;  %1576 = vmatprep.mubr.bf16.mxu1 %v1667_v63  ;;  %v1946_v19 = vmov 0.0   ;;  %v1284_v20 = vmul.f32 %v1268_v5, %v2034_v10  ;;  %v1332_v21 = vmul.f32 %v1316_v6, %v2038_v16 }
 0x100   :  { %1727 = vmatpush3.bf16.msra.mxu0 %v1180_v4  ;;  %v1666_v25 = vcombine.low %v2437_v52, %v2439_v53  ;;  %v1299_v26 = vadd.f32 %v1283_v14, %v1251_v12  ;;  %v1333_v27 = vmul.f32 %v1317_v9, %v2038_v16  ;;  %v1249_v28 = vmul.f32 %v1233_v11, %v2049_v35  ;;  %v1261_v52 = vld [vmem:[#allocation12 + $0x40] sm:$0xff]  ;;  %v1262_v53 = vld [vmem:[#allocation12 + $0x48] sm:$0xff] }
 0x101   :  { %v1196_v18 = vpack.c.bf16 %v1117_v7, %v1116_v2  ;;  %1765 = vmatprep.subr.bf16.mxu0 %v1946_v19  ;;  %v1300_v30 = vadd.f32 %v1284_v20, %v1252_v13  ;;  %v1250_v31 = vmul.f32 %v1234_v15, %v2049_v35  ;;  %v1281_v32 = vmul.f32 %v1265_v17, %v2034_v10  ;;  %v1227_v15 = vld [vmem:[#allocation10 + $0x30] sm:$0xff]  ;;  %v1228_v17 = vld [vmem:[#allocation10 + $0x38] sm:$0xff] }
 0x102   :  { %v1348_v37 = vadd.f32 %v1332_v21, %v1299_v26  ;;  %v1282_v38 = vmul.f32 %v1266_v22, %v2034_v10  ;;  %v1330_v39 = vmul.f32 %v1314_v23, %v2038_v16  ;;  %v1331_v40 = vmul.f32 %v1315_v24, %v2038_v16  ;;  %v1260_v22 = vld [vmem:[#allocation12 + $0x38] sm:$0xff] }
 0x103   :  { %1749 = vmatpush3.bf16.msra.mxu1 %v1196_v18  ;;  %1536 = vmatmul.mubr.bf16.vlgmr.msra.gmra.mxu0 %v1664_v8  ;;  %v1349_v43 = vadd.f32 %v1333_v27, %v1300_v30  ;;  %v1297_v44 = vadd.f32 %v1281_v32, %v1249_v28  ;;  %v1247_v45 = vmul.f32 %v1231_v29, %v2049_v35  ;;  %v1259_v18 = vld [vmem:[#allocation12 + $0x30] sm:$0xff]  ;;  %v1309_v26 = vld [vmem:[#allocation12 + $0xb8] sm:$0xff]  ;;  %v1226_v32 = vld [vmem:[#allocation10 + $0x28] sm:$0xff] }
 0x104   :  { %v1298_v48 = vadd.f32 %v1282_v38, %v1250_v31  ;;  %v1248_v49 = vmul.f32 %v1232_v33, %v2049_v35  ;;  %v1279_v50 = vmul.f32 %v1263_v34, %v2034_v10  ;;  %v1280_v51 = vmul.f32 %v1264_v36, %v2034_v10  ;;  %v1225_v31 = vld [vmem:[#allocation10 + $0x20] sm:$0xff]  ;;  %v1258_v38 = vld [vmem:[#allocation12 + $0x28] sm:$0xff]  ;;  %1781 = vmatprep.mubr.msk.bf16.mxu0 %vm1947_vm0, %v1946_v19 }
 0x105   :  { %v1357_v55 = vpack.c.bf16 %v1349_v43, %v1348_v37  ;;  %v1346_v56 = vadd.f32 %v1330_v39, %v1297_v44  ;;  %v1328_v57 = vmul.f32 %v1312_v41, %v2038_v16  ;;  %v1329_v58 = vmul.f32 %v1313_v42, %v2038_v16  ;;  %v1257_v33 = vld [vmem:[#allocation12 + $0x20] sm:$0xff]  ;;  %v1307_v43 = vld [vmem:[#allocation12 + $0xa8] sm:$0xff] }
 0x106   :  { %1577 = vmatmul.mubr.bf16.vlgmr.msra.gmra.mxu1 %v1666_v25  ;;  %v1347_v60 = vadd.f32 %v1331_v40, %v1298_v48  ;;  %v1295_v61 = vadd.f32 %v1279_v50, %v1247_v45  ;;  %v1296_v62 = vadd.f32 %v1280_v51, %v1248_v49  ;;  %v1245_v63 = vmul.f32 %v1229_v46, %v2049_v35  ;;  %v1308_v25 = vld [vmem:[#allocation12 + $0xb0] sm:$0xff]  ;;  %v1306_v42 = vld [vmem:[#allocation12 + $0xa0] sm:$0xff]  ;;  %v1224_v50 = vld [vmem:[#allocation10 + $0x18] sm:$0xff] }
 0x107   :  { %1766 = vmatpush3.bf16.msra.mxu0 %v1357_v55  ;;  %v1246_v0 = vmul.f32 %v1230_v47, %v2049_v35  ;;  %v1277_v1 = vmul.f32 %v1261_v52, %v2034_v10  ;;  %v1278_v3 = vmul.f32 %v1262_v53, %v2034_v10  ;;  %v1326_v4 = vmul.f32 %v1310_v54, %v2038_v16  ;;  %v1223_v49 = vld [vmem:[#allocation10 + $0x10] sm:$0xff]  ;;  %v1256_v55 = vld [vmem:[#allocation12 + $0x18] sm:$0xff] }
 0x108   :  { %1767 = vmatprep.subr.bf16.mxu0 %v1946_v19  ;;  %v1356_v2 = vpack.c.bf16 %v1347_v60, %v1346_v56  ;;  %v1344_v5 = vadd.f32 %v1328_v57, %v1295_v61  ;;  %v1345_v6 = vadd.f32 %v1329_v58, %v1296_v62  ;;  %v1327_v7 = vmul.f32 %v1311_v59, %v2038_v16  ;;  %v1255_v51 = vld [vmem:[#allocation12 + $0x10] sm:$0xff]  ;;  %v1305_v60 = vld [vmem:[#allocation12 + $0x98] sm:$0xff] }
 0x109   :  { %v1293_v8 = vadd.f32 %v1277_v1, %v1245_v63  ;;  %v1294_v9 = vadd.f32 %v1278_v3, %v1246_v0  ;;  %v1243_v20 = vmul.f32 %v1227_v15, %v2049_v35  ;;  %v1244_v21 = vmul.f32 %v1228_v17, %v2049_v35  ;;  %v1304_v59 = vld [vmem:[#allocation12 + $0x90] sm:$0xff]  ;;  %v1221_v3 = vld [vmem:[#allocation10] sm:$0xff] }
 0x10a   :  { %v1355_v11 = vpack.c.bf16 %v1345_v6, %v1344_v5  ;;  %v1275_v23 = vmul.f32 %v1259_v18, %v2034_v10  ;;  %v1276_v24 = vmul.f32 %v1260_v22, %v2034_v10  ;;  %v1324_v28 = vmul.f32 %v1308_v25, %v2038_v16  ;;  %v1212_v25 = vld [vmem:[%s2539_s4] sm:$0x1] }
 0x10b   :  { %1768 = vmatpush3.bf16.msra.mxu0 %v1356_v2  ;;  %v1342_v12 = vadd.f32 %v1326_v4, %v1293_v8  ;;  %v1343_v13 = vadd.f32 %v1327_v7, %v1294_v9  ;;  %v1325_v29 = vmul.f32 %v1309_v26, %v2038_v16  ;;  %v1241_v36 = vmul.f32 %v1225_v31, %v2049_v35  ;;  %v1222_v4 = vld [vmem:[#allocation10 + $0x8] sm:$0xff]  ;;  %v1253_v2 = vld [vmem:[#allocation12] sm:$0xff] }
 0x10c   :  { %1769 = vmatprep.subr.bf16.mxu0 %v1946_v19  ;;  %v1291_v27 = vadd.f32 %v1275_v23, %v1243_v20  ;;  %v1292_v30 = vadd.f32 %v1276_v24, %v1244_v21  ;;  %v1242_v37 = vmul.f32 %v1226_v32, %v2049_v35  ;;  %v1273_v39 = vmul.f32 %v1257_v33, %v2034_v10  ;;  %v1254_v8 = vld [vmem:[#allocation12 + $0x8] sm:$0xff]  ;;  %v1214_v26 = vld [vmem:[%s2540_s5] sm:$0x1]  ;;  %v1658_v31 = vld [vmem:[%s2540_s5 + $0x1] sm:$0x1] }
 0x10d   :  { %v1354_v14 = vpack.c.bf16 %v1343_v13, %v1342_v12  ;;  %v1274_v41 = vmul.f32 %v1258_v38, %v2034_v10  ;;  %v1322_v45 = vmul.f32 %v1306_v42, %v2038_v16  ;;  %v1323_v46 = vmul.f32 %v1307_v43, %v2038_v16  ;;  %v1302_v13 = vld [vmem:[#allocation12 + $0x80] sm:$0xff] }
 0x10e   :  { %v1340_v34 = vadd.f32 %v1324_v28, %v1291_v27  ;;  %v1341_v40 = vadd.f32 %v1325_v29, %v1292_v30  ;;  %v1289_v44 = vadd.f32 %v1273_v39, %v1241_v36  ;;  %v1239_v53 = vmul.f32 %v1223_v49, %v2049_v35 }
 0x10f   :  { %1770 = vmatpush3.bf16.msra.mxu0 %v1355_v11  ;;  %v1290_v48 = vadd.f32 %v1274_v41, %v1242_v37  ;;  %v1240_v54 = vmul.f32 %v1224_v50, %v2049_v35  ;;  %v1271_v56 = vmul.f32 %v1255_v51, %v2034_v10  ;;  %v1272_v58 = vmul.f32 %v1256_v55, %v2034_v10 }
 0x110   :  { %1771 = vmatprep.subr.bf16.mxu0 %v1946_v19  ;;  %v1353_v47 = vpack.c.bf16 %v1341_v40, %v1340_v34  ;;  %v1338_v52 = vadd.f32 %v1322_v45, %v1289_v44  ;;  %v1320_v62 = vmul.f32 %v1304_v59, %v2038_v16  ;;  %v1321_v63 = vmul.f32 %v1305_v60, %v2038_v16 }
 0x111   :  { %v1339_v57 = vadd.f32 %v1323_v46, %v1290_v48  ;;  %v1287_v61 = vadd.f32 %v1271_v56, %v1239_v53  ;;  %v1288_v1 = vadd.f32 %v1272_v58, %v1240_v54  ;;  %v1237_v6 = vmul.f32 %v1221_v3, %v2049_v35 }
 0x112   :  { %v1238_v7 = vmul.f32 %v1222_v4, %v2049_v35  ;;  %v1269_v9 = vmul.f32 %v1253_v2, %v2034_v10  ;;  %v1270_v12 = vmul.f32 %v1254_v8, %v2034_v10  ;;  %v1318_v17 = vmul.f32 %v1302_v13, %v2038_v16  ;;  %v1358_v8 = vld [vmem:[%s2543_s8] sm:$0x1]  ;;  %v1659_v13 = vld [vmem:[%s2544_s9 + $0x1] sm:$0x1]  ;;  %s1948_s8 = smov [#allocation13]  }
 0x113   :  { %1772 = vmatpush3.bf16.msra.mxu0 %v1354_v14  ;;  %v1352_v0 = vpack.c.bf16 %v1339_v57, %v1338_v52  ;;  %v1336_v5 = vadd.f32 %v1320_v62, %v1287_v61  ;;  %v1337_v11 = vadd.f32 %v1321_v63, %v1288_v1  ;;  %v1303_v14 = vld [vmem:[#allocation12 + $0x88] sm:$0xff]  ;;  %v1213_v28 = vmul.f32 %v1212_v25, %v2049_v35  ;;  %s1642_s6 = sshll.u32 %s1948_s8, 4  ;;  %s1643_s6 = int_to_ptr.vmem [resolvable:$true] %s1642_s6 }
 0x114   :  { %1773 = vmatprep.subr.bf16.mxu0 %v1946_v19  ;;  %v1285_v15 = vadd.f32 %v1269_v9, %v1237_v6  ;;  %v1319_v18 = vmul.f32 %v1303_v14, %v2038_v16  ;;  %v1286_v21 = vadd.f32 %v1270_v12, %v1238_v7  ;;  %v1215_v29 = vmul.f32 %v1214_v26, %v2034_v10  ;;  %v1360_v9 = vld [vmem:[%s2544_s9] sm:$0x1]  ;;  %s1906_s14 = scalar_lea.vmem %s1643_s6, 256  ;;  %p1911_p12 = scmp.lt.s32.totalorder %s1643_s6, %s1643_s6 }
 0x115   :  { %v1351_v20 = vpack.c.bf16 %v1337_v11, %v1336_v5  ;;  %v1376_v30 = vlaneseq  ;;  %v1219_v32 = vmul.f32 %v1658_v31, %v2038_v16  ;;  %v1359_v11 = vmul.f32 %v1358_v8, %v2049_v35  ;;  %p1907_p11 = scmp.ne.s32.totalorder %s1643_s6, %s1906_s14  ;;  %p1912_p13 = scmp.lt.s32.totalorder %s1906_s14, %s1906_s14 }
 0x116   :  { %v1334_v22 = vadd.f32 %v1318_v17, %v1285_v15  ;;  %v1335_v23 = vadd.f32 %v1319_v18, %v1286_v21  ;;  %v1361_v12 = vmul.f32 %v1360_v9, %v2034_v10  ;;  %v1365_v15 = vmul.f32 %v1659_v13, %v2038_v16 }
 0x117   :  { %1774 = vmatpush3.bf16.msra.mxu0 %v1353_v47  ;;  %v1377_v33 = vshrl.u32 %v1376_v30, 7  ;;  %p1913_p0 = por %p1912_p13, %p1911_p12 }
 0x118   :  { %1775 = vmatprep.subr.bf16.mxu0 %v1946_v19  ;;  %v1350_v24 = vpack.c.bf16 %v1335_v23, %v1334_v22  ;;  %v1362_v14 = vadd.f32 %v1361_v12, %v1359_v11 }
 0x119   :  { %v1378_v38 = vsub.s32 0, %v1377_v33  ;;  %p1914_p1 = pnand %p1913_p0, %p1907_p11 }
 0x11a   :  { %v1366_v17 = vadd.f32 %v1365_v15, %v1362_v14 }
 0x11b   :  { %1776 = vmatpush3.bf16.msra.mxu0 %v1352_v0 }
 0x11c   :  { %1777 = vmatprep.subr.bf16.mxu0 %v1946_v19  ;;  %v1592_v18 = vrot.slane %v1366_v17, %v1378_v38 }
 0x11f   :  { %1778 = vmatpush3.bf16.msra.mxu0 %v1351_v20 }
 0x120   :  { %1779 = vmatprep.subr.bf16.mxu0 %v1946_v19  ;;  %v1216_v19 = vadd.f32 %v1215_v29, %v1213_v28 }
 0x122   :  { %v1220_v37 = vadd.f32 %v1219_v32, %v1216_v19 }
 0x123   :  { %1780 = vmatpush3.bf16.msra.mxu0 %v1350_v24 }
 0x124   :  { %v1379_v41 = vrot.slane %v1220_v37, %v1378_v38 }
 0x16a   :  { %v1684_v27 = vpop.f32.mrf.mxu0 }
 0x16c   :  { %v1685_v34 = vpop.f32.mrf.mxu0  ;;  %v1706_v36 = vpop.f32.mrf.mxu1 }
 0x16d   :  { %v1686_v42 = vadd.f32 %v1685_v34, %v1684_v27 }
 0x16e   :  { %v1687_v39 = vpop.f32.mrf.mxu0  ;;  %v1707_v40 = vpop.f32.mrf.mxu1 }
 0x16f   :  { %v1456_v46 = vadd.f32 %v1686_v42, %v1379_v41  ;;  %v1708_v47 = vadd.f32 %v1707_v40, %v1706_v36 }
 0x170   :  { %v1688_v43 = vpop.f32.mrf.mxu0  ;;  %v1709_v44 = vpop.f32.mrf.mxu1 }
 0x171   :  { %v1689_v45 = vadd.f32 %v1688_v43, %v1687_v39  ;;  %v1497_v54 = vadd.f32 %v1708_v47, %v1456_v46 }
 0x172   :  { %v1710_v49 = vpop.f32.mrf.mxu1 }
 0x173   :  { %v1459_v51 = vadd.f32 %v1689_v45, %v1379_v41  ;;  %v1711_v56 = vadd.f32 %v1710_v49, %v1709_v44 }
 0x175   :  { %v1500_v60 = vadd.f32 %v1711_v56, %v1459_v51 }
 0x1c3   :  { %v1728_v48 = vpop.f32.mrf.mxu0 }
 0x1c5   :  { %v1729_v50 = vpop.f32.mrf.mxu0 }
 0x1c6   :  { %v1750_v52 = vpop.f32.mrf.mxu1  ;;  %v1730_v53 = vadd.f32 %v1729_v50, %v1728_v48 }
 0x1c7   :  { %v1731_v55 = vpop.f32.mrf.mxu0 }
 0x1c8   :  { %v1751_v57 = vpop.f32.mrf.mxu1  ;;  %v1538_v58 = vadd.f32 %v1730_v53, %v1497_v54 }
 0x1c9   :  { %v1732_v59 = vpop.f32.mrf.mxu0  ;;  %v1752_v63 = vadd.f32 %v1751_v57, %v1750_v52 }
 0x1ca   :  { %v1753_v61 = vpop.f32.mrf.mxu1  ;;  %v1733_v62 = vadd.f32 %v1732_v59, %v1731_v55 }
 0x1cb   :  { %v1579_v3 = vadd.f32 %v1752_v63, %v1538_v58 }
 0x1cc   :  { %v1541_v0 = vadd.f32 %v1733_v62, %v1500_v60  ;;  %v1754_v1 = vpop.f32.mrf.mxu1 }
 0x1cd   :  { %v1755_v4 = vadd.f32 %v1754_v1, %v1753_v61  ;;  %v1585_v5 = vmax.f32 %v1579_v3, 0.0 }
 0x1cf   :  { %v1582_v2 = vadd.f32 %v1755_v4, %v1541_v0 }
 0x1d1   :  { %v1586_v6 = vmax.f32 %v1582_v2, 0.0 }
 0x1d3   :  { %v1587_v7 = vpack.c.bf16 %v1586_v6, %v1585_v5 }
 0x1d5   :  { %1782 = vmatmul.mubr.bf16.vlgmr.msra.gmra.mxu0 %v1587_v7 }
 0x295   :  { %v1628_v20 = vpop.f32.mrf.mxu0 }
 0x296   :  { %v1629_v21 = vadd.f32 %v1628_v20, %v1592_v18 }
 0x297   :  { %v1783_v22 = vpop.f32.mrf.mxu0 }
 0x298   :  { %1635 = vst [vmem:[#allocation13] sm:$0xff] %v1629_v21 }
 0x299   :  { %v1631_v23 = vpop.f32.mrf.mxu0 }
 0x29a   :  { %v1632_v24 = vadd.f32 %v1631_v23, %v1592_v18 }
 0x29b   :  { %v1784_v35 = vpop.f32.mrf.mxu0 }
 0x29c   :  { %1636 = vst [vmem:[#allocation13 + $0x8] sm:$0xff] %v1632_v24 }
 0x29d   :  { %1917 = shalt.err (!%p1914_p1)
}
 0x29e   :  { %1648 = dma.vmem_to_hbm [thread:$0]  %s1643_s6, 256, %s2545_s10, [#allocation4], %s1937_s16, %s1937_s16, %s1938_s17  }
 0x29f   :  { %1934 = dma.done.wait [#allocation4], 256  }
 0x2a0   :  { %1935 = vsyncadd [#allocation4], 4294967040 }
 0x2a1   :  { %1652 = vsyncpa [#allocation3], 1 }
 0x2a2   :  { %1653 = vsyncpa [#allocation8], 1 }
 0x2a3   :  { %1654 = vsyncpa [#allocation11], 1 }
 0x2a4   :  { %1655 = vsyncpa [#allocation4], 1 }
 0x2a5   :  { %1656 = vsyncpa [#allocation5], 1 }

</bundles_post_ra>
